<compile_context>
chip_gen: v7x
topology: tpu7x:2x2x1
jax: 0.10.0
libtpu: 0.0.40
codegen_flags: <defaults>
</compile_context>

<pallas_src>
import jax
import jax.numpy as jnp
from jax.experimental import pallas as pl
from jax.experimental.pallas import tpu as pltpu


def classifier_kernel(x_ref, w_ref, o_ref):
    # x_ref: (TN, C, HW)   w_ref: (C, K) f32, pre-scaled by 1/(H*W)   o_ref: (TN, K)
    x = x_ref[...].astype(jnp.float32)          # no-op for f32; f32 accumulation for bf16
    gap_sum = jnp.sum(x, axis=-1)               # lane-axis reduce (XLU) -> (TN, C)
    out = jnp.dot(gap_sum, w_ref[...],
                  preferred_element_type=jnp.float32)   # MXU, (TN, K)
    o_ref[...] = out.astype(o_ref.dtype)


def _vmem_capacity_bytes():
    """Physical VMEM of the current chip; conservative (v7x = 64 MiB) fallback."""
    try:
        return int(pltpu.get_tpu_info().vmem_capacity_bytes)
    except Exception:
        return 64 * 1024 * 1024


def _gen_params(vmem_capacity):
    """Generation-aware budgets.
    128-MiB chips (v5e/v6e): large tiles, high scoped limit.
    64-MiB chips (v7x): tighter budget + force >=2 grid steps for the 2 TCs."""
    if vmem_capacity >= 100 * 1024 * 1024:
        return {"per_buf": 40 * 1024 * 1024,
                "vmem_limit": 96 * 1024 * 1024,
                "force_two_steps": False}
    return {"per_buf": 12 * 1024 * 1024,
            "vmem_limit": 40 * 1024 * 1024,
            "force_two_steps": True}


def _pick_batch_tile(n, c, hw, itemsize, params):
    """Largest multiple-of-8 batch tile whose double-buffered x slab fits the
    per-buffer budget; on v7x also guarantee the batch grid has >= 2 steps."""
    if n <= 8:
        return n                                    # block == full dim is always legal
    per_row_bytes = c * hw * itemsize
    tn = params["per_buf"] // max(per_row_bytes, 1)
    tn = max(8, (tn // 8) * 8)                      # sublane constraint on the output block
    tn = min(tn, (n // 8) * 8)                      # don't exceed the array
    if params["force_two_steps"] and n >= 16:
        tn = min(tn, max(8, 8 * (n // 16)))         # >= 2 steps -> both TensorCores busy
    return max(tn, 8)


def classifier_forward(x, conv_weight, *, tn=None):
    """x: (N, C, H, W) (NCHW, same as PyTorch).
       conv_weight: (K, C, 1, 1) (PyTorch Conv2d weight layout)."""
    N, C, H, W = x.shape
    K = conv_weight.shape[0]
    HW = H * W

    # Free reshape of contiguous NCHW -> (N, C, HW); no HBM transpose pass.
    x_flat = x.reshape(N, C, HW)
    # Pre-transposed (C, K) weight with the 1/(H*W) mean scale folded in (f32, resident).
    w_ck = conv_weight.reshape(K, C).T.astype(jnp.float32) * jnp.float32(1.0 / HW)

    params = _gen_params(_vmem_capacity_bytes())
    per_row_bytes = C * HW * x.dtype.itemsize

    if tn is None:
        tn = _pick_batch_tile(N, C, HW, x.dtype.itemsize, params)
    else:
        # Validate/round user-supplied tn: must be a multiple of 8 or exactly N
        # (sublane constraint on the (tn, K) output block).
        tn = int(tn)
        if tn >= N:
            tn = N
        else:
            tn = min(max(8, (tn // 8) * 8), N)
        # Sanity clamp so 2x (double-buffered) x tiles still fit the scoped budget.
        if tn < N and 2 * tn * per_row_bytes > 2 * params["per_buf"]:
            cap = max(8, (params["per_buf"] // max(per_row_bytes, 1) // 8) * 8)
            tn = max(8, min(tn, cap))

    grid = (pl.cdiv(N, tn),)

    return pl.pallas_call(
        classifier_kernel,
        out_shape=jax.ShapeDtypeStruct((N, K), x.dtype),
        grid=grid,
        in_specs=[
            pl.BlockSpec((tn, C, HW), lambda i: (i, 0, 0)),   # streamed batch tiles (NCHW order)
            pl.BlockSpec((C, K), lambda i: (0, 0)),           # weight resident across steps
        ],
        out_specs=pl.BlockSpec((tn, K), lambda i: (i, 0)),
        compiler_params=pltpu.CompilerParams(
            dimension_semantics=("parallel",),                # megacore / 2-TC sharding
            vmem_limit_bytes=params["vmem_limit"],
        ),
    )(x_flat, w_ck)


# TODO(synk): calculate_cam (relu(conv2d) + flip/add) is not part of forward(); not implemented here.
# TODO(synk): if profiling shows masked vst overhead from K=20, pad the output lane dim to 128
#             in-kernel and slice in the wrapper (expected <5%, low priority).


if __name__ == "__main__":
    # Small shapes consistent with the module: num_classes=20, modest channel count,
    # batch chosen so the grid has >1 step (exercises tiling/pipelining).
    num_classes = 20
    in_channels = 256
    N, H, W = 16, 16, 16

    key = jax.random.PRNGKey(0)
    kx, kw = jax.random.split(key)
    x = jax.random.normal(kx, (N, in_channels, H, W), dtype=jnp.float32)
    # Same shape as nn.Conv2d(in_channels, num_classes, (1,1), bias=False).weight
    conv_weight = (jax.random.normal(kw, (num_classes, in_channels, 1, 1),
                                     dtype=jnp.float32) * 0.02)

    out = classifier_forward(x, conv_weight, tn=8)   # grid=(2,)
    out = jax.block_until_ready(out)

    # Pure-JAX reference check (mean -> 1x1 conv -> view)
    ref = jnp.mean(x, axis=(2, 3)) @ conv_weight.reshape(num_classes, in_channels).T
    assert out.shape == (N, num_classes)
    assert jnp.allclose(out, ref, atol=1e-5, rtol=1e-5), "mismatch vs reference"

    # Also exercise the auto-tile path (single call, generation-aware tn).
    out_auto = jax.block_until_ready(classifier_forward(x, conv_weight))
    assert jnp.allclose(out_auto, ref, atol=1e-5, rtol=1e-5), "mismatch vs reference (auto tn)"

    print("KERNEL_OK")
</pallas_src>

<mosaic_0001>
module attributes {stable_mosaic.version = 11 : i64} {
  func.func @classifier_kernel(%arg0: i32, %arg1: memref<8x256x256xf32, #tpu.memory_space<vmem>>, %arg2: memref<256x20xf32, #tpu.memory_space<vmem>>, %arg3: memref<8x20xf32, #tpu.memory_space<vmem>>) attributes {dimension_semantics = [#tpu.dimension_semantics<parallel>], iteration_bounds = array<i64: 2>, scalar_prefetch = 0 : i64, scratch_operands = 0 : i64, tpu.core_type = #tpu.core_type<tc>, window_params = [{transform_indices = @transform_0, window_bounds = array<i64: 8, 256, 256>}, {pipeline_mode = #tpu.pipeline_mode<synchronous>, transform_indices = @transform_1, window_bounds = array<i64: 256, 20>}, {transform_indices = @transform_2, window_bounds = array<i64: 8, 20>}]} {
    %c0 = arith.constant 0 : index
    %c0_0 = arith.constant 0 : index
    %c0_1 = arith.constant 0 : index
    %0 = vector.load %arg1[%c0, %c0_0, %c0_1] : memref<8x256x256xf32, #tpu.memory_space<vmem>>, vector<8x256x256xf32>
    %cst = arith.constant dense<0.000000e+00> : vector<8x256xf32>
    %1 = vector.multi_reduction <add>, %0, %cst [2] : vector<8x256x256xf32> to vector<8x256xf32>
    %c0_2 = arith.constant 0 : index
    %c0_3 = arith.constant 0 : index
    %2 = vector.load %arg2[%c0_2, %c0_3] : memref<256x20xf32, #tpu.memory_space<vmem>>, vector<256x20xf32>
    %cst_4 = arith.constant dense<0.000000e+00> : vector<8x20xf32>
    %3 = tpu.matmul %1, %2, %cst_4 {dimension_numbers = #tpu.dot_dimension_numbers<[1], [0], [0], [1], [0, 0, 1, 1], [], []>} : vector<8x256xf32>, vector<256x20xf32>, vector<8x20xf32> -> vector<8x20xf32>
    %c0_5 = arith.constant 0 : index
    %c0_6 = arith.constant 0 : index
    %4 = vector.load %arg3[%c0_5, %c0_6] : memref<8x20xf32, #tpu.memory_space<vmem>>, vector<8x20xf32>
    tpu.vector_store %arg3[%c0_5, %c0_6], %3 {strides = array<i32>} : memref<8x20xf32, #tpu.memory_space<vmem>>, vector<8x20xf32>,
    return
  }
  func.func @transform_0(%arg0: i32) -> (i32, i32, i32) {
    %c0_i32 = arith.constant 0 : i32
    %c0_i32_0 = arith.constant 0 : i32
    %c0_i32_1 = arith.constant 0 : i32
    return %arg0, %c0_i32, %c0_i32_0 : i32, i32, i32
  }
  func.func @transform_1(%arg0: i32) -> (i32, i32) {
    %c0_i32 = arith.constant 0 : i32
    %c0_i32_0 = arith.constant 0 : i32
    %c0_i32_1 = arith.constant 0 : i32
    return %c0_i32, %c0_i32_0 : i32, i32
  }
  func.func @transform_2(%arg0: i32) -> (i32, i32) {
    %c0_i32 = arith.constant 0 : i32
    %c0_i32_0 = arith.constant 0 : i32
    return %arg0, %c0_i32 : i32, i32
  }
}

</mosaic_0001>

<bundles_post_ra>
// kernel: tpu_custom_call.1
= control target key start
LH: loop header
LB: loop body
LE: loop exit
PB: predicated region body
PF: predicated region fallthrough
CT: control target
= control target key end

     0   :  { %7 = vsyncpa [#allocation3], 0  ;;  %s5042_s0 = inlined_call_operand.hbm [shape: f32[16,256,256], index: 0, kind: input, shape index: {}]   ;;  %s5043_s1 = inlined_call_operand.vmem [shape: f32[256,20], index: 1, kind: input, shape index: {}]   ;;  %s5044_s2 = inlined_call_operand.hbm [shape: f32[16,20], index: 2, kind: output, shape index: {}]  }
   0x1   :  { %9 = vsyncpa [#allocation3 + $0x1], 0 }
   0x2   :  { %10 = vsyncpa [#allocation4], 0 }
   0x3   :  { %12 = vsyncpa [#allocation4 + $0x1], 0  ;;  %s3455_s9 = smov 0   ;;  %s3457_s10 = smov 0  }
   0x4   :  { %s3459_s11 = smov 0   ;;  %s3461_s12 = smov 0  }
   0x5 LB: > { %s3476_s13 = sadd.s32 4294967295, %s3434_s12   ;;  %s3207_s14 = sadd.s32 4294967294, %s3434_s12   ;;  %s3434_s12 = sphi %s3461_s12, %s5057_s12   ;;  %s3430_s11 = sphi %s3459_s11, %s5056_s11   ;;  %s3426_s10 = sphi %s3457_s10, %s5055_s10   ;;  %s3422_s9 = sphi %s3455_s9, %s5054_s9  }
   0x6   : > { %s3480_s15 = sadd.s32 1, %s3434_s12   ;;  %s25_s16 = sadd.s32 1, %s3430_s11 }
   0x7   : > { %s22_s17 = ssub.s32 %s3434_s12, %s3480_s15  ;;  %p32_p0 = scmp.ne.s32.totalorder %s3430_s11, %s3426_s10 }
   0x8   : > { %p23_p1 = scmp.eq.s32.totalorder %s22_s17, 0  ;;  %p33_p2 = scmp.eq.s32.totalorder %s3434_s12, 0 }
   0x9   : > { %p38_p3 = scmp.ne.s32.totalorder %s3426_s10, %s3422_s9  ;;  %p39_p4 = scmp.eq.s32.totalorder %s3476_s13, 0 }
   0xa   : > { %s3492_s18 = scalar_select %p23_p1, %s3430_s11, %s25_s16  }
   0xb   : > { %p3494_p5 = por %p33_p2, %p32_p0  ;;  %p3498_p6 = por %p39_p4, %p38_p3 }
   0xc   : > { %p83_p7 = scmp.eq.s32.totalorder %s3476_s13, 1  ;;  %p89_p8 = scmp.eq.s32.totalorder %s3207_s14, 1 }
   0xd   : > { %p3302_p10 = scmp.lt.s32.totalorder %s3434_s12, 2  ;;  %s112_s23 = sand.u32 1, %s3430_s11  }
   0xe   : > { %p3505_p11 = por %p83_p7, %p32_p0  ;;  %p3509_p12 = por %p89_p8, %p38_p3 }
   0xf   : > { %s3222_s24 = sshll.u32 %s3434_s12, 16  ;;  %s3210_s25 = sshll.u32 %s112_s23, 12 }
  0x10   : > { %s5048_s21 = scalar_select %p3505_p11, 1, 0 }
  0x11   : > { %s5049_s22 = scalar_select %p3509_p12, 1, 0 }
  0x12   : > { %s3518_s28 = scalar_lea.hbm %s5042_s0, %s3222_s24  ;;  %s116_s29 = scalar_lea.vmem [#allocation2], %s3210_s25 }
  0x13   : > { %s124_s30 = sshll.u32 %s116_s29, 4  ;;  %p3522_p13 = pnand %p3302_p10, %p3494_p5  ;;  %s3526_s30 = int_to_ptr.vmem [resolvable:$true] %s124_s30 }
  0x14   : > { %s3528_s4 = scalar_lea.sflag [#allocation3], %s112_s23  ;;  %s3338_s5 = scalar_lea.hbm %s3518_s28, 65536 }
  0x15   : > { %p3339_p0 = scmp.ne.s32.totalorder %s3518_s28, %s3338_s5  ;;  %p3340_p1 = pneg %p3522_p13 }
  0x16   : > { %s3343_s8 = scalar_lea.hbm %s5042_s0, 131072  ;;  %p3344_p4 = scmp.lt.u32.totalorder %s3518_s28, %s5042_s0 }
  0x17   : > { %p3341_p2 = pnand %p3340_p1, %p3339_p0  ;;  %p3345_p5 = scmp.lt.u32.totalorder %s3343_s8, %s3338_s5 }
  0x18   : > { %p3347_p8 = scmp.lt.u32.totalorder %s3338_s5, %s3518_s28 }
  0x19   : > { %p3342_p3 = pneg %p3341_p2  ;;  %p3346_p7 = por %p3345_p5, %p3344_p4 }
  0x1b   : > { %p3348_p10 = por %p3347_p8, %p3346_p7 }
  0x1d   : > { %p3349_p9 = pnand %p3348_p10, %p3342_p3 }
  0x1f   : > { %3352 = shalt.err (!%p3349_p9)
}
  0x20   : > { %s3353_s17 = scalar_lea.vmem %s3526_s30, 65536  ;;  %s3436_s19 = smov [#allocation2]  }
  0x21   : > { %p3354_p0 = scmp.ne.s32.totalorder %s3526_s30, %s3353_s17  ;;  %s3358_s23 = sshll.u32 %s3436_s19, 4  ;;  %s3359_s23 = int_to_ptr.vmem [resolvable:$false] %s3358_s23 }
  0x22   : > { %s3360_s24 = scalar_lea.vmem %s3359_s23, 131072  ;;  %p3361_p11 = scmp.lt.s32.totalorder %s3526_s30, %s3359_s23 }
  0x23   : > { %p3356_p2 = pnand %p3354_p0, %p3340_p1  ;;  %p3362_p4 = scmp.lt.s32.totalorder %s3360_s24, %s3353_s17 }
  0x25   : > { %p3357_p12 = pneg %p3356_p2  ;;  %p3363_p5 = por %p3362_p4, %p3361_p11 }
  0x27   : > { %p3364_p7 = pnand %p3363_p5, %p3357_p12 }
  0x29   : > { %3367 = shalt.err (!%p3364_p7)
}
  0x2a   : > { %s3437_s25 = smov 256   ;;  %s3438_s26 = smov 16  }
  0x2b   : > { %3297 = dma.hbm_to_vmem [thread:$0]  (!%p3522_p13), %s3518_s28, 65536, %s3526_s30, %s3528_s4, %s3437_s25, %s3437_s25, %s3438_s26  }
  0x2c   : > { %p3214_p9 = scmp.ge.s32.totalorder %s3434_s12, 1  ;;  %p132_p1 = scmp.lt.s32.totalorder %s3434_s12, 3 }
  0x2e   : > { %p133_p3 = pnand %p3214_p9, %p132_p1 }
  0x2f   : > { %s3559_s27 = sand.u32 (!%p133_p3), 1, %s3426_s10  }
  0x30   : > { %136 = sbr.rel (%p133_p3) target bundleno = 944 (0x3b0), region = 28  ;;  %s3215_s29 = sshll.u32 (!%p133_p3), %s3559_s27, 12 }
  0x31   : > { %s139_s5 = scalar_lea.sflag (!%p133_p3), [#allocation3], %s3559_s27  ;;  %s3563_s6 = scalar_lea.vmem (!%p133_p3), [#allocation2], %s3215_s29 }
  0x37   : > { %3413 = dma.done.wait (%p3498_p6), %s139_s5, 65536  }
  0x38   : > { %3415 = vsyncadd (%p3498_p6), %s139_s5, 4294901760  ;;  %v168_v0 = vld [vmem:[%s3563_s6 + $0x20] sm:$0xff]  ;;  %v169_v1 = vld [vmem:[%s3563_s6 + $0x28] sm:$0xff]  ;;  %vm1743_vm0 = vcmask 130112   ;;  %vm1750_vm1 = vcmask 195712   ;;  %vm1757_vm2 = vcmask 261312  }
  0x39   : > { %v164_v2 = vld [vmem:[%s3563_s6] sm:$0xff]  ;;  %v682_v3 = vadd.f32 %v169_v1, %v168_v0  ;;  %v165_v4 = vld [vmem:[%s3563_s6 + $0x8] sm:$0xff]  ;;  %v170_v5 = vld [vmem:[%s3563_s6 + $0x30] sm:$0xff]  ;;  %vm1764_vm3 = vcmask 326912   ;;  %vm1771_vm4 = vcmask 392512   ;;  %vm1778_vm5 = vcmask 458112  }
  0x3a   : > { %v171_v6 = vld [vmem:[%s3563_s6 + $0x38] sm:$0xff]  ;;  %v676_v7 = vadd.f32 %v165_v4, %v164_v2  ;;  %v166_v8 = vld [vmem:[%s3563_s6 + $0x10] sm:$0xff]  ;;  %v172_v14 = vld [vmem:[%s3563_s6 + $0x40] sm:$0xff]  ;;  %vm1785_vm6 = vcmask 523712   ;;  %vm1792_vm7 = vcmask 589312   ;;  %vm1799_vm8 = vcmask 654912  }
  0x3b   : > { %v167_v9 = vld [vmem:[%s3563_s6 + $0x18] sm:$0xff]  ;;  %683 = vadd.xlane.f32.xlu1 %v682_v3  ;;  %v685_v10 = vadd.f32 %v171_v6, %v170_v5  ;;  %v174_v12 = vld [vmem:[%s3563_s6 + $0x50] sm:$0xff]  ;;  %v173_v15 = vld [vmem:[%s3563_s6 + $0x48] sm:$0xff]  ;;  %vm1806_vm9 = vcmask 720512   ;;  %vm1813_vm10 = vcmask 786112   ;;  %vm1820_vm11 = vcmask 851712  }
  0x3c   : > { %677 = vadd.xlane.f32.xlu0 %v676_v7  ;;  %v679_v11 = vadd.f32 %v167_v9, %v166_v8  ;;  %v175_v13 = vld [vmem:[%s3563_s6 + $0x58] sm:$0xff]  ;;  %v688_v17 = vadd.f32 %v173_v15, %v172_v14  ;;  %v178_v18 = vld [vmem:[%s3563_s6 + $0x70] sm:$0xff]  ;;  %v176_v20 = vld [vmem:[%s3563_s6 + $0x60] sm:$0xff]  ;;  %vm1827_vm12 = vcmask 917312   ;;  %vm1834_vm13 = vcmask 982912   ;;  %s3216_s19 = sshll.u32 %s3559_s27, 3 }
  0x3d   : > { %v691_v16 = vadd.f32 %v175_v13, %v174_v12  ;;  %v179_v19 = vld [vmem:[%s3563_s6 + $0x78] sm:$0xff]  ;;  %v177_v21 = vld [vmem:[%s3563_s6 + $0x68] sm:$0xff]  ;;  %v182_v24 = vld [vmem:[%s3563_s6 + $0x90] sm:$0xff]  ;;  %vm1841_vm14 = vcmask 1048512   ;;  %vm3028_vm15 = vcmask 1041409   ;;  %s3218_s23 = sshll.u32 %s3476_s13, 7 }
  0x3e   : > { %v697_v22 = vadd.f32 %v179_v19, %v178_v18  ;;  %v694_v23 = vadd.f32 %v177_v21, %v176_v20  ;;  %v183_v25 = vld [vmem:[%s3563_s6 + $0x98] sm:$0xff]  ;;  %v180_v26 = vld [vmem:[%s3563_s6 + $0x80] sm:$0xff]  ;;  %v181_v27 = vld [vmem:[%s3563_s6 + $0x88] sm:$0xff]  ;;  %s162_s24 = scalar_lea.vmem [#allocation5], %s3216_s19  ;;  %s4998_s5 = scalar_lea.hbm %s5044_s2, %s3218_s23 }
  0x3f   : > { %686 = vadd.xlane.f32.xlu1 %v685_v10  ;;  %v703_v28 = vadd.f32 %v183_v25, %v182_v24  ;;  %v700_v29 = vadd.f32 %v181_v27, %v180_v26  ;;  %v186_v30 = vld [vmem:[%s3563_s6 + $0xb0] sm:$0xff]  ;;  %v187_v31 = vld [vmem:[%s3563_s6 + $0xb8] sm:$0xff]  ;;  %v184_v32 = vld [vmem:[%s3563_s6 + $0xa0] sm:$0xff]  ;;  %s3137_s25 = sshll.u32 %s162_s24, 4  ;;  %s3124_s20 = scalar_lea.sflag [#allocation4], %s3559_s27  ;;  %s5000_s25 = int_to_ptr.vmem [resolvable:$true] %s3137_s25 }
  0x40   : > { %680 = vadd.xlane.f32.xlu0 %v679_v11  ;;  %v185_v33 = vld [vmem:[%s3563_s6 + $0xa8] sm:$0xff]  ;;  %v709_v34 = vadd.f32 %v187_v31, %v186_v30  ;;  %v190_v36 = vld [vmem:[%s3563_s6 + $0xd0] sm:$0xff]  ;;  %v191_v37 = vld [vmem:[%s3563_s6 + $0xd8] sm:$0xff]  ;;  %s3368_s28 = scalar_lea.vmem %s5000_s25, 128  ;;  %p5051_p11 = scmp.ne.s32.totalorder %s5048_s21, 0 }
  0x41   : > { %v706_v35 = vadd.f32 %v185_v33, %v184_v32  ;;  %v188_v38 = vld [vmem:[%s3563_s6 + $0xc0] sm:$0xff]  ;;  %v189_v39 = vld [vmem:[%s3563_s6 + $0xc8] sm:$0xff]  ;;  %v715_v40 = vadd.f32 %v191_v37, %v190_v36  ;;  %v194_v42 = vld [vmem:[%s3563_s6 + $0xf0] sm:$0xff]  ;;  %p3369_p6 = scmp.ne.s32.totalorder %s5000_s25, %s3368_s28  ;;  %s3439_s13 = smov [#allocation5]  }
  0x42   : > { %v712_v41 = vadd.f32 %v189_v39, %v188_v38  ;;  %v195_v43 = vld [vmem:[%s3563_s6 + $0xf8] sm:$0xff]  ;;  %v192_v44 = vld [vmem:[%s3563_s6 + $0xe0] sm:$0xff]  ;;  %v193_v45 = vld [vmem:[%s3563_s6 + $0xe8] sm:$0xff]  ;;  %s3372_s30 = sshll.u32 %s3439_s13, 4  ;;  %s3373_s30 = int_to_ptr.vmem [resolvable:$false] %s3372_s30 }
  0x43   : > { %692 = vadd.xlane.f32.xlu1 %v691_v16  ;;  %v721_v46 = vadd.f32 %v195_v43, %v194_v42  ;;  %v718_v47 = vadd.f32 %v193_v45, %v192_v44  ;;  %v198_v48 = vld [vmem:[%s3563_s6 + $0x110] sm:$0xff]  ;;  %v199_v49 = vld [vmem:[%s3563_s6 + $0x118] sm:$0xff]  ;;  %v196_v50 = vld [vmem:[%s3563_s6 + $0x100] sm:$0xff]  ;;  %p3370_p12 = pnand %p3369_p6, %p5051_p11  ;;  %s3374_s3 = scalar_lea.vmem %s3373_s30, 256 }
  0x44   : > { %689 = vadd.xlane.f32.xlu0 %v688_v17  ;;  %v197_v51 = vld [vmem:[%s3563_s6 + $0x108] sm:$0xff]  ;;  %v727_v52 = vadd.f32 %v199_v49, %v198_v48  ;;  %v202_v54 = vld [vmem:[%s3563_s6 + $0x130] sm:$0xff]  ;;  %v203_v55 = vld [vmem:[%s3563_s6 + $0x138] sm:$0xff]  ;;  %p3375_p8 = scmp.lt.s32.totalorder %s5000_s25, %s3373_s30  ;;  %p3376_p10 = scmp.lt.s32.totalorder %s3374_s3, %s3368_s28 }
  0x45   : > { %v724_v53 = vadd.f32 %v197_v51, %v196_v50  ;;  %v200_v56 = vld [vmem:[%s3563_s6 + $0x120] sm:$0xff]  ;;  %v201_v57 = vld [vmem:[%s3563_s6 + $0x128] sm:$0xff]  ;;  %v733_v58 = vadd.f32 %v203_v55, %v202_v54  ;;  %v206_v60 = vld [vmem:[%s3563_s6 + $0x150] sm:$0xff]  ;;  %p3371_p13 = pneg %p3370_p12 }
  0x46   : > { %v730_v59 = vadd.f32 %v201_v57, %v200_v56  ;;  %v207_v61 = vld [vmem:[%s3563_s6 + $0x158] sm:$0xff]  ;;  %v204_v62 = vld [vmem:[%s3563_s6 + $0x140] sm:$0xff]  ;;  %v205_v63 = vld [vmem:[%s3563_s6 + $0x148] sm:$0xff]  ;;  %p3377_p0 = por %p3376_p10, %p3375_p8 }
  0x47   : > { %698 = vadd.xlane.f32.xlu1 %v697_v22  ;;  %v739_v0 = vadd.f32 %v207_v61, %v206_v60  ;;  %v736_v1 = vadd.f32 %v205_v63, %v204_v62  ;;  %v210_v2 = vld [vmem:[%s3563_s6 + $0x170] sm:$0xff]  ;;  %v211_v3 = vld [vmem:[%s3563_s6 + $0x178] sm:$0xff]  ;;  %v208_v4 = vld [vmem:[%s3563_s6 + $0x160] sm:$0xff] }
  0x48   : > { %695 = vadd.xlane.f32.xlu0 %v694_v23  ;;  %v209_v5 = vld [vmem:[%s3563_s6 + $0x168] sm:$0xff]  ;;  %v745_v6 = vadd.f32 %v211_v3, %v210_v2  ;;  %v214_v8 = vld [vmem:[%s3563_s6 + $0x190] sm:$0xff]  ;;  %v215_v9 = vld [vmem:[%s3563_s6 + $0x198] sm:$0xff]  ;;  %p3378_p2 = pnand %p3377_p0, %p3371_p13 }
  0x49   : > { %v742_v7 = vadd.f32 %v209_v5, %v208_v4  ;;  %v212_v10 = vld [vmem:[%s3563_s6 + $0x180] sm:$0xff]  ;;  %v213_v11 = vld [vmem:[%s3563_s6 + $0x188] sm:$0xff]  ;;  %v751_v12 = vadd.f32 %v215_v9, %v214_v8  ;;  %v218_v14 = vld [vmem:[%s3563_s6 + $0x1b0] sm:$0xff] }
  0x4a   : > { %v748_v13 = vadd.f32 %v213_v11, %v212_v10  ;;  %v219_v15 = vld [vmem:[%s3563_s6 + $0x1b8] sm:$0xff]  ;;  %v216_v16 = vld [vmem:[%s3563_s6 + $0x1a0] sm:$0xff]  ;;  %v217_v17 = vld [vmem:[%s3563_s6 + $0x1a8] sm:$0xff] }
  0x4b   : > { %704 = vadd.xlane.f32.xlu1 %v703_v28  ;;  %v757_v18 = vadd.f32 %v219_v15, %v218_v14  ;;  %v754_v19 = vadd.f32 %v217_v17, %v216_v16  ;;  %v222_v20 = vld [vmem:[%s3563_s6 + $0x1d0] sm:$0xff]  ;;  %v223_v21 = vld [vmem:[%s3563_s6 + $0x1d8] sm:$0xff]  ;;  %v220_v22 = vld [vmem:[%s3563_s6 + $0x1c0] sm:$0xff] }
  0x4c   : > { %701 = vadd.xlane.f32.xlu0 %v700_v29  ;;  %v221_v23 = vld [vmem:[%s3563_s6 + $0x1c8] sm:$0xff]  ;;  %v763_v24 = vadd.f32 %v223_v21, %v222_v20  ;;  %v226_v26 = vld [vmem:[%s3563_s6 + $0x1f0] sm:$0xff]  ;;  %v227_v27 = vld [vmem:[%s3563_s6 + $0x1f8] sm:$0xff] }
  0x4d   : > { %v760_v25 = vadd.f32 %v221_v23, %v220_v22  ;;  %v224_v28 = vld [vmem:[%s3563_s6 + $0x1e0] sm:$0xff]  ;;  %v225_v29 = vld [vmem:[%s3563_s6 + $0x1e8] sm:$0xff]  ;;  %v769_v30 = vadd.f32 %v227_v27, %v226_v26  ;;  %v230_v32 = vld [vmem:[%s3563_s6 + $0x210] sm:$0xff] }
  0x4e   : > { %v766_v31 = vadd.f32 %v225_v29, %v224_v28  ;;  %v231_v33 = vld [vmem:[%s3563_s6 + $0x218] sm:$0xff]  ;;  %v234_v38 = vld [vmem:[%s3563_s6 + $0x230] sm:$0xff] }
  0x4f   : > { %710 = vadd.xlane.f32.xlu1 %v709_v34  ;;  %v228_v34 = vld [vmem:[%s3563_s6 + $0x200] sm:$0xff]  ;;  %v775_v36 = vadd.f32 %v231_v33, %v230_v32  ;;  %v235_v39 = vld [vmem:[%s3563_s6 + $0x238] sm:$0xff]  ;;  %v238_v44 = vld [vmem:[%s3563_s6 + $0x250] sm:$0xff] }
  0x50   : > { %707 = vadd.xlane.f32.xlu0 %v706_v35  ;;  %v229_v35 = vld [vmem:[%s3563_s6 + $0x208] sm:$0xff]  ;;  %v781_v42 = vadd.f32 %v235_v39, %v234_v38  ;;  %v239_v45 = vld [vmem:[%s3563_s6 + $0x258] sm:$0xff]  ;;  %v242_v50 = vld [vmem:[%s3563_s6 + $0x270] sm:$0xff] }
  0x51   : > { %v772_v37 = vadd.f32 %v229_v35, %v228_v34  ;;  %v787_v48 = vadd.f32 %v239_v45, %v238_v44  ;;  %v243_v51 = vld [vmem:[%s3563_s6 + $0x278] sm:$0xff]  ;;  %v246_v56 = vld [vmem:[%s3563_s6 + $0x290] sm:$0xff] }
  0x52   : > { %v793_v54 = vadd.f32 %v243_v51, %v242_v50  ;;  %v247_v57 = vld [vmem:[%s3563_s6 + $0x298] sm:$0xff]  ;;  %v250_v62 = vld [vmem:[%s3563_s6 + $0x2b0] sm:$0xff] }
  0x53   : > { %716 = vadd.xlane.f32.xlu1 %v715_v40  ;;  %v232_v40 = vld [vmem:[%s3563_s6 + $0x220] sm:$0xff]  ;;  %v799_v60 = vadd.f32 %v247_v57, %v246_v56  ;;  %v251_v63 = vld [vmem:[%s3563_s6 + $0x2b8] sm:$0xff]  ;;  %v254_v4 = vld [vmem:[%s3563_s6 + $0x2d0] sm:$0xff] }
  0x54   : > { %713 = vadd.xlane.f32.xlu0 %v712_v41  ;;  %v233_v41 = vld [vmem:[%s3563_s6 + $0x228] sm:$0xff]  ;;  %v805_v2 = vadd.f32 %v251_v63, %v250_v62  ;;  %v255_v5 = vld [vmem:[%s3563_s6 + $0x2d8] sm:$0xff]  ;;  %v258_v10 = vld [vmem:[%s3563_s6 + $0x2f0] sm:$0xff] }
  0x55   : > { %v778_v43 = vadd.f32 %v233_v41, %v232_v40  ;;  %v811_v8 = vadd.f32 %v255_v5, %v254_v4  ;;  %v259_v11 = vld [vmem:[%s3563_s6 + $0x2f8] sm:$0xff]  ;;  %v262_v16 = vld [vmem:[%s3563_s6 + $0x310] sm:$0xff] }
  0x56   : > { %v817_v14 = vadd.f32 %v259_v11, %v258_v10  ;;  %v263_v17 = vld [vmem:[%s3563_s6 + $0x318] sm:$0xff]  ;;  %v266_v22 = vld [vmem:[%s3563_s6 + $0x330] sm:$0xff] }
  0x57   : > { %722 = vadd.xlane.f32.xlu1 %v721_v46  ;;  %v236_v46 = vld [vmem:[%s3563_s6 + $0x240] sm:$0xff]  ;;  %v823_v20 = vadd.f32 %v263_v17, %v262_v16  ;;  %v267_v23 = vld [vmem:[%s3563_s6 + $0x338] sm:$0xff]  ;;  %v270_v28 = vld [vmem:[%s3563_s6 + $0x350] sm:$0xff]  ;;  %v1732_v17 = vlaneseq }
  0x58   : > { %719 = vadd.xlane.f32.xlu0 %v718_v47  ;;  %v237_v47 = vld [vmem:[%s3563_s6 + $0x248] sm:$0xff]  ;;  %v829_v26 = vadd.f32 %v267_v23, %v266_v22  ;;  %v271_v29 = vld [vmem:[%s3563_s6 + $0x358] sm:$0xff]  ;;  %v274_v34 = vld [vmem:[%s3563_s6 + $0x370] sm:$0xff] }
  0x59   : > { %v784_v49 = vadd.f32 %v237_v47, %v236_v46  ;;  %v835_v32 = vadd.f32 %v271_v29, %v270_v28  ;;  %v275_v35 = vld [vmem:[%s3563_s6 + $0x378] sm:$0xff]  ;;  %v278_v40 = vld [vmem:[%s3563_s6 + $0x390] sm:$0xff]  ;;  %v305_v22 = vld [vmem:[%s3563_s6 + $0x468] sm:$0xff] }
  0x5a   : > { %v841_v38 = vadd.f32 %v275_v35, %v274_v34  ;;  %v279_v41 = vld [vmem:[%s3563_s6 + $0x398] sm:$0xff]  ;;  %v282_v46 = vld [vmem:[%s3563_s6 + $0x3b0] sm:$0xff]  ;;  %v308_v28 = vld [vmem:[%s3563_s6 + $0x480] sm:$0xff] }
  0x5b   : > { %728 = vadd.xlane.f32.xlu1 %v727_v52  ;;  %v240_v52 = vld [vmem:[%s3563_s6 + $0x260] sm:$0xff]  ;;  %v847_v44 = vadd.f32 %v279_v41, %v278_v40  ;;  %v283_v47 = vld [vmem:[%s3563_s6 + $0x3b8] sm:$0xff]  ;;  %v309_v29 = vld [vmem:[%s3563_s6 + $0x488] sm:$0xff] }
  0x5c   : > { %725 = vadd.xlane.f32.xlu0 %v724_v53  ;;  %v241_v53 = vld [vmem:[%s3563_s6 + $0x268] sm:$0xff]  ;;  %v853_v50 = vadd.f32 %v283_v47, %v282_v46  ;;  %v312_v40 = vld [vmem:[%s3563_s6 + $0x4a0] sm:$0xff] }
  0x5d   : > { %v790_v55 = vadd.f32 %v241_v53, %v240_v52  ;;  %v286_v52 = vld [vmem:[%s3563_s6 + $0x3d0] sm:$0xff]  ;;  %v287_v53 = vld [vmem:[%s3563_s6 + $0x3d8] sm:$0xff]  ;;  %v313_v41 = vld [vmem:[%s3563_s6 + $0x4a8] sm:$0xff] }
  0x5e   : > { %v859_v56 = vadd.f32 %v287_v53, %v286_v52  ;;  %v319_v52 = vld [vmem:[%s3563_s6 + $0x4d8] sm:$0xff] }
  0x5f   : > { %734 = vadd.xlane.f32.xlu1 %v733_v58  ;;  %v244_v58 = vld [vmem:[%s3563_s6 + $0x280] sm:$0xff] }
  0x60   : > { %731 = vadd.xlane.f32.xlu0 %v730_v59  ;;  %v245_v59 = vld [vmem:[%s3563_s6 + $0x288] sm:$0xff] }
  0x61   : > { %v796_v61 = vadd.f32 %v245_v59, %v244_v58  ;;  %v290_v58 = vld [vmem:[%s3563_s6 + $0x3f0] sm:$0xff]  ;;  %v291_v59 = vld [vmem:[%s3563_s6 + $0x3f8] sm:$0xff] }
  0x62   : > { %v865_v62 = vadd.f32 %v291_v59, %v290_v58 }
  0x63   : > { %740 = vadd.xlane.f32.xlu1 %v739_v0  ;;  %v248_v0 = vld [vmem:[%s3563_s6 + $0x2a0] sm:$0xff] }
  0x64   : > { %737 = vadd.xlane.f32.xlu0 %v736_v1  ;;  %v249_v1 = vld [vmem:[%s3563_s6 + $0x2a8] sm:$0xff] }
  0x65   : > { %v802_v3 = vadd.f32 %v249_v1, %v248_v0  ;;  %v294_v0 = vld [vmem:[%s3563_s6 + $0x410] sm:$0xff]  ;;  %v295_v1 = vld [vmem:[%s3563_s6 + $0x418] sm:$0xff] }
  0x66   : > { %v871_v4 = vadd.f32 %v295_v1, %v294_v0 }
  0x67   : > { %746 = vadd.xlane.f32.xlu1 %v745_v6  ;;  %v252_v6 = vld [vmem:[%s3563_s6 + $0x2c0] sm:$0xff] }
  0x68   : > { %743 = vadd.xlane.f32.xlu0 %v742_v7  ;;  %v253_v7 = vld [vmem:[%s3563_s6 + $0x2c8] sm:$0xff] }
  0x69   : > { %v808_v9 = vadd.f32 %v253_v7, %v252_v6  ;;  %v298_v6 = vld [vmem:[%s3563_s6 + $0x430] sm:$0xff]  ;;  %v299_v7 = vld [vmem:[%s3563_s6 + $0x438] sm:$0xff] }
  0x6a   : > { %v877_v10 = vadd.f32 %v299_v7, %v298_v6 }
  0x6b   : > { %752 = vadd.xlane.f32.xlu1 %v751_v12  ;;  %v256_v12 = vld [vmem:[%s3563_s6 + $0x2e0] sm:$0xff] }
  0x6c   : > { %749 = vadd.xlane.f32.xlu0 %v748_v13  ;;  %v257_v13 = vld [vmem:[%s3563_s6 + $0x2e8] sm:$0xff] }
  0x6d   : > { %v814_v15 = vadd.f32 %v257_v13, %v256_v12  ;;  %v302_v12 = vld [vmem:[%s3563_s6 + $0x450] sm:$0xff]  ;;  %v303_v13 = vld [vmem:[%s3563_s6 + $0x458] sm:$0xff] }
  0x6e   : > { %v883_v16 = vadd.f32 %v303_v13, %v302_v12 }
  0x6f   : > { %758 = vadd.xlane.f32.xlu1 %v757_v18  ;;  %v260_v18 = vld [vmem:[%s3563_s6 + $0x300] sm:$0xff] }
  0x70   : > { %755 = vadd.xlane.f32.xlu0 %v754_v19  ;;  %v261_v19 = vld [vmem:[%s3563_s6 + $0x308] sm:$0xff] }
  0x71   : > { %v820_v21 = vadd.f32 %v261_v19, %v260_v18  ;;  %v306_v19 = vld [vmem:[%s3563_s6 + $0x470] sm:$0xff] }
  0x73   : > { %764 = vadd.xlane.f32.xlu1 %v763_v24  ;;  %v264_v24 = vld [vmem:[%s3563_s6 + $0x320] sm:$0xff] }
  0x74   : > { %761 = vadd.xlane.f32.xlu0 %v760_v25  ;;  %v265_v25 = vld [vmem:[%s3563_s6 + $0x328] sm:$0xff] }
  0x75   : > { %v826_v27 = vadd.f32 %v265_v25, %v264_v24  ;;  %v3713_v24 = vand.u32 127, %v1732_v17 }
  0x77   : > { %770 = vadd.xlane.f32.xlu1 %v769_v30  ;;  %v268_v30 = vld [vmem:[%s3563_s6 + $0x340] sm:$0xff]  ;;  %v1780_v58 = vadd.s32 4294967240, %v3713_v24  ;;  %v1794_v12 = vadd.s32 4294967224, %v3713_v24 }
  0x78   : > { %767 = vadd.xlane.f32.xlu0 %v766_v31  ;;  %v269_v31 = vld [vmem:[%s3563_s6 + $0x348] sm:$0xff] }
  0x79   : > { %v832_v33 = vadd.f32 %v269_v31, %v268_v30  ;;  %v3719_v30 = vshrl.u32 %v1732_v17, 7  ;;  %v1752_v31 = vadd.s32 4294967272, %v3713_v24 }
  0x7b   : > { %776 = vadd.xlane.f32.xlu1 %v775_v36  ;;  %v272_v36 = vld [vmem:[%s3563_s6 + $0x360] sm:$0xff] }
  0x7c   : > { %773 = vadd.xlane.f32.xlu0 %v772_v37  ;;  %v273_v37 = vld [vmem:[%s3563_s6 + $0x368] sm:$0xff] }
  0x7d   : > { %v838_v39 = vadd.f32 %v273_v37, %v272_v36  ;;  %v892_v36 = vadd.f32 %v309_v29, %v308_v28  ;;  %v314_v37 = vld [vmem:[%s3563_s6 + $0x4b0] sm:$0xff]  ;;  %v324_v28 = vld [vmem:[%s3563_s6 + $0x500] sm:$0xff]  ;;  %v325_v29 = vld [vmem:[%s3563_s6 + $0x508] sm:$0xff] }
  0x7f   : > { %782 = vadd.xlane.f32.xlu1 %v781_v42  ;;  %v276_v42 = vld [vmem:[%s3563_s6 + $0x380] sm:$0xff] }
  0x80   : > { %779 = vadd.xlane.f32.xlu0 %v778_v43  ;;  %v277_v43 = vld [vmem:[%s3563_s6 + $0x388] sm:$0xff] }
  0x81   : > { %v844_v45 = vadd.f32 %v277_v43, %v276_v42  ;;  %v1766_v42 = vadd.s32 4294967256, %v3713_v24  ;;  %v1759_v43 = vadd.s32 4294967264, %v3713_v24 }
  0x83   : > { %788 = vadd.xlane.f32.xlu1 %v787_v48  ;;  %v280_v48 = vld [vmem:[%s3563_s6 + $0x3a0] sm:$0xff] }
  0x84   : > { %785 = vadd.xlane.f32.xlu0 %v784_v49  ;;  %v281_v49 = vld [vmem:[%s3563_s6 + $0x3a8] sm:$0xff] }
  0x85   : > { %v850_v51 = vadd.f32 %v281_v49, %v280_v48 }
  0x87   : > { %794 = vadd.xlane.f32.xlu1 %v793_v54  ;;  %v284_v54 = vld [vmem:[%s3563_s6 + $0x3c0] sm:$0xff] }
  0x88   : > { %791 = vadd.xlane.f32.xlu0 %v790_v55  ;;  %v285_v55 = vld [vmem:[%s3563_s6 + $0x3c8] sm:$0xff] }
  0x89   : > { %v856_v57 = vadd.f32 %v285_v55, %v284_v54  ;;  %v3746_v54 = vsub.s32 %v1766_v42, %v3719_v30  ;;  %v3749_v55 = vsub.s32 %v1759_v43, %v3719_v30 }
  0x8b   : > { %800 = vadd.xlane.f32.xlu1 %v799_v60  ;;  %v288_v60 = vld [vmem:[%s3563_s6 + $0x3e0] sm:$0xff] }
  0x8c   : > { %797 = vadd.xlane.f32.xlu0 %v796_v61  ;;  %v289_v61 = vld [vmem:[%s3563_s6 + $0x3e8] sm:$0xff] }
  0x8d   : > { %v862_v63 = vadd.f32 %v289_v61, %v288_v60 }
  0x8f   : > { %806 = vadd.xlane.f32.xlu1 %v805_v2  ;;  %v292_v2 = vld [vmem:[%s3563_s6 + $0x400] sm:$0xff] }
  0x90   : > { %803 = vadd.xlane.f32.xlu0 %v802_v3  ;;  %v293_v3 = vld [vmem:[%s3563_s6 + $0x408] sm:$0xff] }
  0x91   : > { %v868_v5 = vadd.f32 %v293_v3, %v292_v2 }
  0x93   : > { %812 = vadd.xlane.f32.xlu1 %v811_v8  ;;  %v296_v8 = vld [vmem:[%s3563_s6 + $0x420] sm:$0xff] }
  0x94   : > { %809 = vadd.xlane.f32.xlu0 %v808_v9  ;;  %v297_v9 = vld [vmem:[%s3563_s6 + $0x428] sm:$0xff] }
  0x95   : > { %v874_v11 = vadd.f32 %v297_v9, %v296_v8  ;;  %v3765_v9 = vsub.s32 %v1780_v58, %v3719_v30 }
  0x97   : > { %818 = vadd.xlane.f32.xlu1 %v817_v14  ;;  %v300_v14 = vld [vmem:[%s3563_s6 + $0x440] sm:$0xff] }
  0x98   : > { %815 = vadd.xlane.f32.xlu0 %v814_v15  ;;  %v301_v15 = vld [vmem:[%s3563_s6 + $0x448] sm:$0xff] }
  0x99   : > { %v880_v18 = vadd.f32 %v301_v15, %v300_v14 }
  0x9b   : > { %824 = vadd.xlane.f32.xlu1 %v823_v20  ;;  %v307_v20 = vld [vmem:[%s3563_s6 + $0x478] sm:$0xff] }
  0x9c   : > { %821 = vadd.xlane.f32.xlu0 %v820_v21  ;;  %v304_v21 = vld [vmem:[%s3563_s6 + $0x460] sm:$0xff]  ;;  %v889_v23 = vadd.f32 %v307_v20, %v306_v19 }
  0x9d   : > { %v886_v25 = vadd.f32 %v305_v22, %v304_v21  ;;  %v326_v21 = vld [vmem:[%s3563_s6 + $0x510] sm:$0xff]  ;;  %v327_v22 = vld [vmem:[%s3563_s6 + $0x518] sm:$0xff] }
  0x9f   : > { %830 = vadd.xlane.f32.xlu1 %v829_v26  ;;  %v310_v26 = vld [vmem:[%s3563_s6 + $0x490] sm:$0xff] }
  0xa0   : > { %827 = vadd.xlane.f32.xlu0 %v826_v27  ;;  %v311_v27 = vld [vmem:[%s3563_s6 + $0x498] sm:$0xff] }
  0xa1   : > { %v895_v34 = vadd.f32 %v311_v27, %v310_v26  ;;  %v3782_v27 = vsub.s32 %v1794_v12, %v3719_v30 }
  0xa3   : > { %836 = vadd.xlane.f32.xlu1 %v835_v32  ;;  %v1738_v32 = vadd.s32 4294967288, %v3713_v24 }
  0xa4   : > { %833 = vadd.xlane.f32.xlu0 %v832_v33  ;;  %v1745_v33 = vadd.s32 4294967280, %v3713_v24 }
  0xa5   : > { %v3738_v46 = vsub.s32 %v1738_v32, %v3719_v30 }
  0xa6   : > { %v3741_v47 = vsub.s32 %v1745_v33, %v3719_v30 }
  0xa7   : > { %842 = vadd.xlane.f32.xlu1 %v841_v38  ;;  %v315_v38 = vld [vmem:[%s3563_s6 + $0x4b8] sm:$0xff] }
  0xa8   : > { %839 = vadd.xlane.f32.xlu0 %v838_v39  ;;  %v901_v48 = vadd.f32 %v315_v38, %v314_v37  ;;  %v916_v38 = vadd.f32 %v325_v29, %v324_v28 }
  0xab   : > { %848 = vadd.xlane.f32.xlu1 %v847_v44  ;;  %v3732_v44 = vsub.s32 %v3713_v24, %v3719_v30 }
  0xac   : > { %845 = vadd.xlane.f32.xlu0 %v844_v45  ;;  %v3735_v45 = vsub.s32 %v1752_v31, %v3719_v30  ;;  %v1808_v31 = vadd.s32 4294967208, %v3713_v24 }
  0xaf   : > { %854 = vadd.xlane.f32.xlu1 %v853_v50  ;;  %v898_v50 = vadd.f32 %v313_v41, %v312_v40  ;;  %v331_v40 = vld [vmem:[%s3563_s6 + $0x538] sm:$0xff] }
  0xb0   : > { %851 = vadd.xlane.f32.xlu0 %v850_v51  ;;  %v318_v51 = vld [vmem:[%s3563_s6 + $0x4d0] sm:$0xff] }
  0xb1   : > { %v907_v0 = vadd.f32 %v319_v52, %v318_v51  ;;  %v1822_v51 = vadd.s32 4294967192, %v3713_v24 }
  0xb3   : > { %860 = vadd.xlane.f32.xlu1 %v859_v56  ;;  %v316_v56 = vld [vmem:[%s3563_s6 + $0x4c0] sm:$0xff] }
  0xb4   : > { %857 = vadd.xlane.f32.xlu0 %v856_v57  ;;  %v317_v57 = vld [vmem:[%s3563_s6 + $0x4c8] sm:$0xff] }
  0xb5   : > { %v904_v3 = vadd.f32 %v317_v57, %v316_v56  ;;  %v1815_v56 = vadd.s32 4294967200, %v3713_v24 }
  0xb7   : > { %866 = vadd.xlane.f32.xlu1 %v865_v62  ;;  %v1773_v62 = vadd.s32 4294967248, %v3713_v24 }
  0xb8   : > { %863 = vadd.xlane.f32.xlu0 %v862_v63 }
  0xb9   : > { %v3773_v15 = vsub.s32 %v1773_v62, %v3719_v30  ;;  %v335_v62 = vld [vmem:[%s3563_s6 + $0x558] sm:$0xff] }
  0xbb   : > { %872 = vadd.xlane.f32.xlu1 %v871_v4  ;;  %v322_v4 = vld [vmem:[%s3563_s6 + $0x4f0] sm:$0xff] }
  0xbc   : > { %869 = vadd.xlane.f32.xlu0 %v868_v5  ;;  %v323_v5 = vld [vmem:[%s3563_s6 + $0x4f8] sm:$0xff] }
  0xbd   : > { %v913_v17 = vadd.f32 %v323_v5, %v322_v4  ;;  %v333_v4 = vld [vmem:[%s3563_s6 + $0x548] sm:$0xff]  ;;  %v1836_v5 = vadd.s32 4294967176, %v3713_v24 }
  0xbf   : > { %878 = vadd.xlane.f32.xlu1 %v877_v10  ;;  %v320_v10 = vld [vmem:[%s3563_s6 + $0x4e0] sm:$0xff] }
  0xc0   : > { %875 = vadd.xlane.f32.xlu0 %v874_v11  ;;  %v321_v11 = vld [vmem:[%s3563_s6 + $0x4e8] sm:$0xff] }
  0xc1   : > { %v910_v20 = vadd.f32 %v321_v11, %v320_v10 }
  0xc3   : > { %884 = vadd.xlane.f32.xlu1 %v883_v16  ;;  %v1787_v16 = vadd.s32 4294967232, %v3713_v24 }
  0xc4   : > { %881 = vadd.xlane.f32.xlu0 %v880_v18 }
  0xc5   : > { %v3789_v33 = vsub.s32 %v1787_v16, %v3719_v30  ;;  %v339_v16 = vld [vmem:[%s3563_s6 + $0x578] sm:$0xff] }
  0xc7   : > { %890 = vadd.xlane.f32.xlu1 %v889_v23 }
  0xc8   : > { %887 = vadd.xlane.f32.xlu0 %v886_v25  ;;  %v684_v35 = vpop.xlane.xlu1 %683 }
  0xc9   : > { %v678_v39 = vpop.xlane.xlu0 %677  ;;  %v1749_v63 = vrot.slane %v684_v35, %v3741_v47  ;;  %v919_v35 = vadd.f32 %v327_v22, %v326_v21  ;;  %v337_v21 = vld [vmem:[%s3563_s6 + $0x568] sm:$0xff] }
  0xca   : > { %v1737_v59 = vrot.slane %v678_v39, %v3732_v44  ;;  %v330_v39 = vld [vmem:[%s3563_s6 + $0x530] sm:$0xff] }
  0xcb   : > { %896 = vadd.xlane.f32.xlu1 %v895_v34  ;;  %v1801_v34 = vadd.s32 4294967216, %v3713_v24  ;;  %v925_v57 = vadd.f32 %v331_v40, %v330_v39 }
  0xcc   : > { %893 = vadd.xlane.f32.xlu0 %v892_v36  ;;  %v687_v49 = vpop.xlane.xlu1 %686 }
  0xcd   : > { %v681_v53 = vpop.xlane.xlu0 %680  ;;  %v1756_v60 = vrot.slane %v687_v49, %v3735_v45  ;;  %v328_v49 = vld [vmem:[%s3563_s6 + $0x520] sm:$0xff] }
  0xce   : > { %v1742_v61 = vrot.slane %v681_v53, %v3738_v46  ;;  %v3805_v53 = vsub.s32 %v1801_v34, %v3719_v30 }
  0xcf   : > { %902 = vadd.xlane.f32.xlu1 %v901_v48  ;;  %v3798_v48 = vsub.s32 %v1808_v31, %v3719_v30  ;;  %v342_v31 = vld [vmem:[%s3563_s6 + $0x590] sm:$0xff] }
  0xd0   : > { %v1744_v1 = vsel %vm1743_vm0, %v1742_v61, %v1737_v59  ;;  %899 = vadd.xlane.f32.xlu0 %v898_v50  ;;  %v693_v2 = vpop.xlane.xlu1 %692  ;;  %v329_v50 = vld [vmem:[%s3563_s6 + $0x528] sm:$0xff]  ;;  %v334_v61 = vld [vmem:[%s3563_s6 + $0x550] sm:$0xff] }
  0xd1   : > { %v1751_v6 = vsel %vm1750_vm1, %v1749_v63, %v1744_v1  ;;  %v1770_v7 = vrot.slane %v693_v2, %v3746_v54  ;;  %v690_v8 = vpop.xlane.xlu0 %689  ;;  %v3814_v2 = vsub.s32 %v1822_v51, %v3719_v30  ;;  %v931_v10 = vadd.f32 %v335_v62, %v334_v61 }
  0xd2   : > { %v1758_v13 = vsel %vm1757_vm2, %v1756_v60, %v1751_v6  ;;  %v1763_v14 = vrot.slane %v690_v8, %v3749_v55  ;;  %v922_v60 = vadd.f32 %v329_v50, %v328_v49  ;;  %v1829_v8 = vadd.s32 4294967184, %v3713_v24  ;;  %v336_v24 = vld [vmem:[%s3563_s6 + $0x560] sm:$0xff]  ;;  %v347_v49 = vld [vmem:[%s3563_s6 + $0x5b8] sm:$0xff] }
  0xd3   : > { %908 = vadd.xlane.f32.xlu1 %v907_v0  ;;  %v934_v29 = vadd.f32 %v337_v21, %v336_v24  ;;  %v353_v24 = vld [vmem:[%s3563_s6 + $0x5e8] sm:$0xff] }
  0xd4   : > { %v1765_v18 = vsel %vm1764_vm3, %v1763_v14, %v1758_v13  ;;  %905 = vadd.xlane.f32.xlu0 %v904_v3  ;;  %v699_v19 = vpop.xlane.xlu1 %698  ;;  %v332_v3 = vld [vmem:[%s3563_s6 + $0x540] sm:$0xff]  ;;  %v338_v14 = vld [vmem:[%s3563_s6 + $0x570] sm:$0xff] }
  0xd5   : > { %v1784_v23 = vrot.slane %v699_v19, %v3765_v9  ;;  %v1772_v25 = vsel %vm1771_vm4, %v1770_v7, %v1765_v18  ;;  %v696_v26 = vpop.xlane.xlu0 %695  ;;  %v3821_v7 = vsub.s32 %v1815_v56, %v3719_v30  ;;  %v928_v13 = vadd.f32 %v333_v4, %v332_v3  ;;  %v344_v56 = vld [vmem:[%s3563_s6 + $0x5a0] sm:$0xff] }
  0xd6   : > { %v1777_v32 = vrot.slane %v696_v26, %v3773_v15  ;;  %v348_v4 = vld [vmem:[%s3563_s6 + $0x5c0] sm:$0xff] }
  0xd7   : > { %914 = vadd.xlane.f32.xlu1 %v913_v17 }
  0xd8   : > { %v1779_v36 = vsel %vm1778_vm5, %v1777_v32, %v1772_v25  ;;  %911 = vadd.xlane.f32.xlu0 %v910_v20  ;;  %v705_v37 = vpop.xlane.xlu1 %704  ;;  %v3830_v20 = vsub.s32 %v1836_v5, %v3719_v30  ;;  %v937_v25 = vadd.f32 %v339_v16, %v338_v14  ;;  %v343_v32 = vld [vmem:[%s3563_s6 + $0x598] sm:$0xff]  ;;  %v349_v5 = vld [vmem:[%s3563_s6 + $0x5c8] sm:$0xff] }
  0xd9   : > { %v1798_v41 = vrot.slane %v705_v37, %v3782_v27  ;;  %v1786_v42 = vsel %vm1785_vm6, %v1784_v23, %v1779_v36  ;;  %v702_v43 = vpop.xlane.xlu0 %701  ;;  %v3836_v23 = vsub.s32 %v1829_v8, %v3719_v30  ;;  %v340_v30 = vld [vmem:[%s3563_s6 + $0x580] sm:$0xff]  ;;  %v341_v37 = vld [vmem:[%s3563_s6 + $0x588] sm:$0xff]  ;;  %v943_v39 = vadd.f32 %v343_v32, %v342_v31  ;;  %v355_v14 = vld [vmem:[%s3563_s6 + $0x5f8] sm:$0xff] }
  0xda   : > { %v1791_v52 = vrot.slane %v702_v43, %v3789_v33  ;;  %v346_v43 = vld [vmem:[%s3563_s6 + $0x5b0] sm:$0xff]  ;;  %v359_v31 = vld [vmem:[%s3563_s6 + $0x618] sm:$0xff] }
  0xdb   : > { %920 = vadd.xlane.f32.xlu1 %v919_v35 }
  0xdc   : > { %v1793_v58 = vsel %vm1792_vm7, %v1791_v52, %v1786_v42  ;;  %917 = vadd.xlane.f32.xlu0 %v916_v38  ;;  %v711_v59 = vpop.xlane.xlu1 %710  ;;  %v940_v42 = vadd.f32 %v341_v37, %v340_v30  ;;  %v357_v30 = vld [vmem:[%s3563_s6 + $0x608] sm:$0xff] }
  0xdd   : > { %v1812_v63 = vrot.slane %v711_v59, %v3798_v48  ;;  %v1800_v0 = vsel %vm1799_vm8, %v1798_v41, %v1793_v58  ;;  %v708_v1 = vpop.xlane.xlu0 %707  ;;  %v949_v59 = vadd.f32 %v347_v49, %v346_v43  ;;  %v363_v43 = vld [vmem:[%s3563_s6 + $0x638] sm:$0xff] }
  0xde   : > { %v1805_v6 = vrot.slane %v708_v1, %v3805_v53 }
  0xdf   : > { %926 = vadd.xlane.f32.xlu1 %v925_v57  ;;  %v345_v57 = vld [vmem:[%s3563_s6 + $0x5a8] sm:$0xff] }
  0xe0   : > { %v1807_v11 = vsel %vm1806_vm9, %v1805_v6, %v1800_v0  ;;  %923 = vadd.xlane.f32.xlu0 %v922_v60  ;;  %v717_v12 = vpop.xlane.xlu1 %716  ;;  %v946_v62 = vadd.f32 %v345_v57, %v344_v56  ;;  %v351_v0 = vld [vmem:[%s3563_s6 + $0x5d8] sm:$0xff]  ;;  %v360_v56 = vld [vmem:[%s3563_s6 + $0x620] sm:$0xff]  ;;  %v361_v57 = vld [vmem:[%s3563_s6 + $0x628] sm:$0xff] }
  0xe1   : > { %v1826_v17 = vrot.slane %v717_v12, %v3814_v2  ;;  %v1814_v18 = vsel %vm1813_vm10, %v1812_v63, %v1807_v11  ;;  %v714_v19 = vpop.xlane.xlu0 %713  ;;  %v350_v63 = vld [vmem:[%s3563_s6 + $0x5d0] sm:$0xff]  ;;  %v952_v12 = vadd.f32 %v349_v5, %v348_v4  ;;  %v364_v5 = vld [vmem:[%s3563_s6 + $0x640] sm:$0xff] }
  0xe2   : > { %v1819_v22 = vrot.slane %v714_v19, %v3821_v7  ;;  %v955_v8 = vadd.f32 %v351_v0, %v350_v63  ;;  %v352_v19 = vld [vmem:[%s3563_s6 + $0x5e0] sm:$0xff]  ;;  %v389_v0 = vld [vmem:[%s3563_s6 + $0x708] sm:$0xff] }
  0xe3   : > { %932 = vadd.xlane.f32.xlu1 %v931_v10  ;;  %v388_v63 = vld [vmem:[%s3563_s6 + $0x700] sm:$0xff] }
  0xe4   : > { %v1821_v26 = vsel %vm1820_vm11, %v1819_v22, %v1814_v18  ;;  %929 = vadd.xlane.f32.xlu0 %v928_v13  ;;  %v723_v28 = vpop.xlane.xlu1 %722  ;;  %v354_v13 = vld [vmem:[%s3563_s6 + $0x5f0] sm:$0xff] }
  0xe5   : > { %v1840_v34 = vrot.slane %v723_v28, %v3830_v20  ;;  %v1828_v35 = vsel %vm1827_vm12, %v1826_v17, %v1821_v26  ;;  %v720_v36 = vpop.xlane.xlu0 %719  ;;  %v961_v22 = vadd.f32 %v355_v14, %v354_v13  ;;  %v958_v28 = vadd.f32 %v353_v24, %v352_v19  ;;  %v392_v14 = vld [vmem:[%s3563_s6 + $0x720] sm:$0xff]  ;;  %v390_v24 = vld [vmem:[%s3563_s6 + $0x710] sm:$0xff] }
  0xe6   : > { %v1833_v38 = vrot.slane %v720_v36, %v3836_v23  ;;  %v356_v36 = vld [vmem:[%s3563_s6 + $0x600] sm:$0xff] }
  0xe7   : > { %938 = vadd.xlane.f32.xlu1 %v937_v25 }
  0xe8   : > { %v1835_v40 = vsel %vm1834_vm13, %v1833_v38, %v1828_v35  ;;  %935 = vadd.xlane.f32.xlu0 %v934_v29  ;;  %v729_v41 = vpop.xlane.xlu1 %728  ;;  %v358_v29 = vld [vmem:[%s3563_s6 + $0x610] sm:$0xff] }
  0xe9   : > { %v3850_v50 = vsel %vm1841_vm14, %v1840_v34, %v1835_v40  ;;  %v1850_v51 = vrot.slane %v729_v41, %v3738_v46  ;;  %v726_v52 = vpop.xlane.xlu0 %725  ;;  %v967_v38 = vadd.f32 %v359_v31, %v358_v29  ;;  %v964_v41 = vadd.f32 %v357_v30, %v356_v36  ;;  %v454_v31 = vld [vmem:[%s3563_s6 + $0x910] sm:$0xff]  ;;  %v452_v30 = vld [vmem:[%s3563_s6 + $0x900] sm:$0xff] }
  0xea   : > { %v1846_v58 = vrot.slane %v726_v52, %v3732_v44 }
  0xeb   : > { %944 = vadd.xlane.f32.xlu1 %v943_v39 }
  0xec   : > { %v1851_v60 = vsel %vm1743_vm0, %v1850_v51, %v1846_v58  ;;  %941 = vadd.xlane.f32.xlu0 %v940_v42  ;;  %v735_v61 = vpop.xlane.xlu1 %734  ;;  %v362_v42 = vld [vmem:[%s3563_s6 + $0x630] sm:$0xff] }
  0xed   : > { %v1860_v1 = vrot.slane %v735_v61, %v3735_v45  ;;  %v732_v3 = vpop.xlane.xlu0 %731 }
  0xee   : > { %v1855_v6 = vrot.slane %v732_v3, %v3741_v47 }
  0xef   : > { %950 = vadd.xlane.f32.xlu1 %v949_v59  ;;  %v973_v59 = vadd.f32 %v363_v43, %v362_v42  ;;  %v420_v43 = vld [vmem:[%s3563_s6 + $0x800] sm:$0xff] }
  0xf0   : > { %v1856_v10 = vsel %vm1750_vm1, %v1855_v6, %v1851_v60  ;;  %947 = vadd.xlane.f32.xlu0 %v946_v62  ;;  %v741_v11 = vpop.xlane.xlu1 %740  ;;  %v970_v62 = vadd.f32 %v361_v57, %v360_v56  ;;  %v365_v6 = vld [vmem:[%s3563_s6 + $0x648] sm:$0xff]  ;;  %v394_v57 = vld [vmem:[%s3563_s6 + $0x730] sm:$0xff] }
  0xf1   : > { %v1870_v16 = vrot.slane %v741_v11, %v3746_v54  ;;  %v1861_v17 = vsel %vm1757_vm2, %v1860_v1, %v1856_v10  ;;  %v738_v18 = vpop.xlane.xlu0 %737  ;;  %v1012_v10 = vadd.f32 %v389_v0, %v388_v63  ;;  %v976_v13 = vadd.f32 %v365_v6, %v364_v5  ;;  %v456_v0 = vld [vmem:[%s3563_s6 + $0x920] sm:$0xff]  ;;  %v422_v5 = vld [vmem:[%s3563_s6 + $0x810] sm:$0xff]  ;;  %v423_v6 = vld [vmem:[%s3563_s6 + $0x818] sm:$0xff] }
  0xf2   : > { %v1865_v21 = vrot.slane %v738_v18, %v3749_v55 }
  0xf3   : > { %956 = vadd.xlane.f32.xlu1 %v955_v8 }
  0xf4   : > { %v1866_v25 = vsel %vm1764_vm3, %v1865_v21, %v1861_v17  ;;  %953 = vadd.xlane.f32.xlu0 %v952_v12  ;;  %v747_v26 = vpop.xlane.xlu1 %746  ;;  %v391_v21 = vld [vmem:[%s3563_s6 + $0x718] sm:$0xff] }
  0xf5   : > { %v1880_v32 = vrot.slane %v747_v26, %v3765_v9  ;;  %v1871_v34 = vsel %vm1771_vm4, %v1870_v16, %v1866_v25  ;;  %v744_v35 = vpop.xlane.xlu0 %743  ;;  %v393_v16 = vld [vmem:[%s3563_s6 + $0x728] sm:$0xff]  ;;  %v1015_v29 = vadd.f32 %v391_v21, %v390_v24  ;;  %v516_v24 = vld [vmem:[%s3563_s6 + $0xb00] sm:$0xff] }
  0xf6   : > { %v1875_v37 = vrot.slane %v744_v35, %v3773_v15  ;;  %v1018_v25 = vadd.f32 %v393_v16, %v392_v14  ;;  %v518_v14 = vld [vmem:[%s3563_s6 + $0xb10] sm:$0xff]  ;;  %v519_v16 = vld [vmem:[%s3563_s6 + $0xb18] sm:$0xff]  ;;  %v517_v21 = vld [vmem:[%s3563_s6 + $0xb08] sm:$0xff] }
  0xf7   : > { %962 = vadd.xlane.f32.xlu1 %v961_v22 }
  0xf8   : > { %v1876_v39 = vsel %vm1778_vm5, %v1875_v37, %v1871_v34  ;;  %959 = vadd.xlane.f32.xlu0 %v958_v28  ;;  %v753_v40 = vpop.xlane.xlu1 %752  ;;  %v453_v37 = vld [vmem:[%s3563_s6 + $0x908] sm:$0xff] }
  0xf9   : > { %v1890_v49 = vrot.slane %v753_v40, %v3782_v27  ;;  %v1881_v51 = vsel %vm1785_vm6, %v1880_v32, %v1876_v39  ;;  %v750_v52 = vpop.xlane.xlu0 %749  ;;  %v455_v32 = vld [vmem:[%s3563_s6 + $0x918] sm:$0xff]  ;;  %v1108_v42 = vadd.f32 %v453_v37, %v452_v30  ;;  %v396_v30 = vld [vmem:[%s3563_s6 + $0x740] sm:$0xff]  ;;  %v397_v37 = vld [vmem:[%s3563_s6 + $0x748] sm:$0xff] }
  0xfa   : > { %v1885_v58 = vrot.slane %v750_v52, %v3789_v33  ;;  %v1111_v39 = vadd.f32 %v455_v32, %v454_v31  ;;  %v424_v31 = vld [vmem:[%s3563_s6 + $0x820] sm:$0xff]  ;;  %v425_v32 = vld [vmem:[%s3563_s6 + $0x828] sm:$0xff] }
  0xfb   : > { %968 = vadd.xlane.f32.xlu1 %v967_v38 }
  0xfc   : > { %v1886_v60 = vsel %vm1792_vm7, %v1885_v58, %v1881_v51  ;;  %965 = vadd.xlane.f32.xlu0 %v964_v41  ;;  %v759_v61 = vpop.xlane.xlu1 %758  ;;  %v395_v58 = vld [vmem:[%s3563_s6 + $0x738] sm:$0xff] }
  0xfd   : > { %v1900_v1 = vrot.slane %v759_v61, %v3798_v48  ;;  %v1891_v3 = vsel %vm1799_vm8, %v1890_v49, %v1886_v60  ;;  %v756_v4 = vpop.xlane.xlu0 %755  ;;  %v421_v49 = vld [vmem:[%s3563_s6 + $0x808] sm:$0xff]  ;;  %v1021_v63 = vadd.f32 %v395_v58, %v394_v57  ;;  %v458_v58 = vld [vmem:[%s3563_s6 + $0x930] sm:$0xff] }
  0xfe   : > { %v1895_v8 = vrot.slane %v756_v4, %v3805_v53  ;;  %v1060_v60 = vadd.f32 %v421_v49, %v420_v43  ;;  %v484_v43 = vld [vmem:[%s3563_s6 + $0xa00] sm:$0xff]  ;;  %v485_v49 = vld [vmem:[%s3563_s6 + $0xa08] sm:$0xff] }
  0xff   : > { %974 = vadd.xlane.f32.xlu1 %v973_v59 }
 0x100   : > { %v1896_v11 = vsel %vm1806_vm9, %v1895_v8, %v1891_v3  ;;  %971 = vadd.xlane.f32.xlu0 %v970_v62  ;;  %v765_v12 = vpop.xlane.xlu1 %764 }
 0x101   : > { %v1910_v17 = vrot.slane %v765_v12, %v3814_v2  ;;  %v1901_v18 = vsel %vm1813_vm10, %v1900_v1, %v1896_v11  ;;  %v762_v19 = vpop.xlane.xlu0 %761  ;;  %v457_v1 = vld [vmem:[%s3563_s6 + $0x928] sm:$0xff] }
 0x102   : > { %v1905_v22 = vrot.slane %v762_v19, %v3821_v7 }
 0x103   : > { %1013 = vadd.xlane.f32.xlu1 %v1012_v10  ;;  %v1114_v10 = vadd.f32 %v457_v1, %v456_v0  ;;  %v520_v1 = vld [vmem:[%s3563_s6 + $0xb20] sm:$0xff] }
 0x104   : > { %v1906_v26 = vsel %vm1820_vm11, %v1905_v22, %v1901_v18  ;;  %977 = vadd.xlane.f32.xlu0 %v976_v13  ;;  %v771_v28 = vpop.xlane.xlu1 %770  ;;  %v1063_v13 = vadd.f32 %v423_v6, %v422_v5 }
 0x105   : > { %v1920_v34 = vrot.slane %v771_v28, %v3830_v20  ;;  %v1911_v35 = vsel %vm1827_vm12, %v1910_v17, %v1906_v26  ;;  %v768_v36 = vpop.xlane.xlu0 %767 }
 0x106   : > { %v1915_v38 = vrot.slane %v768_v36, %v3836_v23 }
 0x107   : > { %1019 = vadd.xlane.f32.xlu1 %v1018_v25  ;;  %v1207_v25 = vadd.f32 %v519_v16, %v518_v14 }
 0x108   : > { %v1916_v40 = vsel %vm1834_vm13, %v1915_v38, %v1911_v35  ;;  %1016 = vadd.xlane.f32.xlu0 %v1015_v29  ;;  %v777_v41 = vpop.xlane.xlu1 %776  ;;  %v1204_v29 = vadd.f32 %v517_v21, %v516_v24 }
 0x109   : > { %v3915_v51 = vsel %vm1841_vm14, %v1920_v34, %v1916_v40  ;;  %v1929_v52 = vrot.slane %v777_v41, %v3738_v46  ;;  %v774_v56 = vpop.xlane.xlu0 %773 }
 0x10a   : > { %v1925_v59 = vrot.slane %v774_v56, %v3732_v44 }
 0x10b   : > { %1112 = vadd.xlane.f32.xlu1 %v1111_v39  ;;  %v1066_v39 = vadd.f32 %v425_v32, %v424_v31 }
 0x10c   : > { %v1930_v61 = vsel %vm1743_vm0, %v1929_v52, %v1925_v59  ;;  %1109 = vadd.xlane.f32.xlu0 %v1108_v42  ;;  %v783_v62 = vpop.xlane.xlu1 %782  ;;  %v1024_v42 = vadd.f32 %v397_v37, %v396_v30  ;;  %v459_v59 = vld [vmem:[%s3563_s6 + $0x938] sm:$0xff] }
 0x10d   : > { %v1939_v3 = vrot.slane %v783_v62, %v3735_v45  ;;  %v780_v4 = vpop.xlane.xlu0 %779  ;;  %v1117_v0 = vadd.f32 %v459_v59, %v458_v58 }
 0x10e   : > { %v1934_v8 = vrot.slane %v780_v4, %v3741_v47 }
 0x10f   : > { %1061 = vadd.xlane.f32.xlu1 %v1060_v60 }
 0x110   : > { %v1935_v11 = vsel %vm1750_vm1, %v1934_v8, %v1930_v61  ;;  %1022 = vadd.xlane.f32.xlu0 %v1021_v63  ;;  %v789_v12 = vpop.xlane.xlu1 %788  ;;  %v1156_v61 = vadd.f32 %v485_v49, %v484_v43  ;;  %v486_v8 = vld [vmem:[%s3563_s6 + $0xa10] sm:$0xff] }
 0x111   : > { %v1949_v17 = vrot.slane %v789_v12, %v3746_v54  ;;  %v1940_v18 = vsel %vm1757_vm2, %v1939_v3, %v1935_v11  ;;  %v786_v19 = vpop.xlane.xlu0 %785  ;;  %v521_v3 = vld [vmem:[%s3563_s6 + $0xb28] sm:$0xff] }
 0x112   : > { %v1944_v22 = vrot.slane %v786_v19, %v3749_v55  ;;  %v1210_v12 = vadd.f32 %v521_v3, %v520_v1 }
 0x113   : > { %1115 = vadd.xlane.f32.xlu1 %v1114_v10  ;;  %v487_v10 = vld [vmem:[%s3563_s6 + $0xa18] sm:$0xff] }
 0x114   : > { %v1945_v26 = vsel %vm1764_vm3, %v1944_v22, %v1940_v18  ;;  %1064 = vadd.xlane.f32.xlu0 %v1063_v13  ;;  %v795_v28 = vpop.xlane.xlu1 %794  ;;  %v1159_v16 = vadd.f32 %v487_v10, %v486_v8  ;;  %v583_v18 = vld [vmem:[%s3563_s6 + $0xd18] sm:$0xff]  ;;  %v580_v22 = vld [vmem:[%s3563_s6 + $0xd00] sm:$0xff] }
 0x115   : > { %v1959_v34 = vrot.slane %v795_v28, %v3765_v9  ;;  %v1950_v35 = vsel %vm1771_vm4, %v1949_v17, %v1945_v26  ;;  %v792_v36 = vpop.xlane.xlu0 %791  ;;  %v582_v17 = vld [vmem:[%s3563_s6 + $0xd10] sm:$0xff] }
 0x116   : > { %v1954_v38 = vrot.slane %v792_v36, %v3773_v15  ;;  %v1303_v28 = vadd.f32 %v583_v18, %v582_v17  ;;  %v584_v18 = vld [vmem:[%s3563_s6 + $0xd20] sm:$0xff] }
 0x117   : > { %1208 = vadd.xlane.f32.xlu1 %v1207_v25  ;;  %v581_v25 = vld [vmem:[%s3563_s6 + $0xd08] sm:$0xff] }
 0x118   : > { %v1955_v40 = vsel %vm1778_vm5, %v1954_v38, %v1950_v35  ;;  %1205 = vadd.xlane.f32.xlu0 %v1204_v29  ;;  %v801_v41 = vpop.xlane.xlu1 %800  ;;  %v1300_v32 = vadd.f32 %v581_v25, %v580_v22  ;;  %v427_v35 = vld [vmem:[%s3563_s6 + $0x838] sm:$0xff]  ;;  %v398_v38 = vld [vmem:[%s3563_s6 + $0x750] sm:$0xff] }
 0x119   : > { %v1969_v52 = vrot.slane %v801_v41, %v3782_v27  ;;  %v1960_v56 = vsel %vm1785_vm6, %v1959_v34, %v1955_v40  ;;  %v798_v57 = vpop.xlane.xlu0 %797  ;;  %v426_v34 = vld [vmem:[%s3563_s6 + $0x830] sm:$0xff] }
 0x11a   : > { %v1964_v60 = vrot.slane %v798_v57, %v3789_v33  ;;  %v1069_v41 = vadd.f32 %v427_v35, %v426_v34  ;;  %v550_v25 = vld [vmem:[%s3563_s6 + $0xc10] sm:$0xff] }
 0x11b   : > { %1067 = vadd.xlane.f32.xlu1 %v1066_v39  ;;  %v399_v39 = vld [vmem:[%s3563_s6 + $0x758] sm:$0xff]  ;;  %v646_v35 = vld [vmem:[%s3563_s6 + $0xf10] sm:$0xff] }
 0x11c   : > { %v1965_v62 = vsel %vm1792_vm7, %v1964_v60, %v1960_v56  ;;  %1025 = vadd.xlane.f32.xlu0 %v1024_v42  ;;  %v807_v63 = vpop.xlane.xlu1 %806  ;;  %v1027_v49 = vadd.f32 %v399_v39, %v398_v38  ;;  %v489_v56 = vld [vmem:[%s3563_s6 + $0xa28] sm:$0xff]  ;;  %v460_v60 = vld [vmem:[%s3563_s6 + $0x940] sm:$0xff] }
 0x11d   : > { %v1979_v4 = vrot.slane %v807_v63, %v3798_v48  ;;  %v1970_v5 = vsel %vm1799_vm8, %v1969_v52, %v1965_v62  ;;  %v804_v6 = vpop.xlane.xlu0 %803  ;;  %v488_v52 = vld [vmem:[%s3563_s6 + $0xa20] sm:$0xff] }
 0x11e   : > { %v1974_v11 = vrot.slane %v804_v6, %v3805_v53  ;;  %v549_v6 = vld [vmem:[%s3563_s6 + $0xc08] sm:$0xff]  ;;  %v644_v39 = vld [vmem:[%s3563_s6 + $0xf00] sm:$0xff] }
 0x11f   : > { %1157 = vadd.xlane.f32.xlu1 %v1156_v61  ;;  %v461_v61 = vld [vmem:[%s3563_s6 + $0x948] sm:$0xff] }
 0x120   : > { %v1975_v13 = vsel %vm1806_vm9, %v1974_v11, %v1970_v5  ;;  %1118 = vadd.xlane.f32.xlu0 %v1117_v0  ;;  %v813_v14 = vpop.xlane.xlu1 %812  ;;  %v1162_v0 = vadd.f32 %v489_v56, %v488_v52  ;;  %v548_v5 = vld [vmem:[%s3563_s6 + $0xc00] sm:$0xff]  ;;  %v523_v11 = vld [vmem:[%s3563_s6 + $0xb38] sm:$0xff] }
 0x121   : > { %v1989_v19 = vrot.slane %v813_v14, %v3814_v2  ;;  %v1980_v24 = vsel %vm1813_vm10, %v1979_v4, %v1975_v13  ;;  %v810_v21 = vpop.xlane.xlu0 %809  ;;  %v1120_v4 = vadd.f32 %v461_v61, %v460_v60  ;;  %v1252_v13 = vadd.f32 %v549_v6, %v548_v5  ;;  %v400_v56 = vld [vmem:[%s3563_s6 + $0x760] sm:$0xff]  ;;  %v366_v61 = vld [vmem:[%s3563_s6 + $0x650] sm:$0xff] }
 0x122   : > { %v1984_v26 = vrot.slane %v810_v21, %v3821_v7  ;;  %v462_v6 = vld [vmem:[%s3563_s6 + $0x950] sm:$0xff] }
 0x123   : > { %1211 = vadd.xlane.f32.xlu1 %v1210_v12 }
 0x124   : > { %v1985_v29 = vsel %vm1820_vm11, %v1984_v26, %v1980_v24  ;;  %1160 = vadd.xlane.f32.xlu0 %v1159_v16  ;;  %v819_v31 = vpop.xlane.xlu1 %818  ;;  %v551_v26 = vld [vmem:[%s3563_s6 + $0xc18] sm:$0xff] }
 0x125   : > { %v1999_v36 = vrot.slane %v819_v31, %v3830_v20  ;;  %v1990_v30 = vsel %vm1827_vm12, %v1989_v19, %v1985_v29  ;;  %v816_v37 = vpop.xlane.xlu0 %815  ;;  %v585_v19 = vld [vmem:[%s3563_s6 + $0xd28] sm:$0xff]  ;;  %v1255_v34 = vadd.f32 %v551_v26, %v550_v25 }
 0x126   : > { %v1994_v40 = vrot.slane %v816_v37, %v3836_v23  ;;  %v1306_v29 = vadd.f32 %v585_v19, %v584_v18 }
 0x127   : > { %1304 = vadd.xlane.f32.xlu1 %v1303_v28 }
 0x128   : > { %v1995_v42 = vsel %vm1834_vm13, %v1994_v40, %v1990_v30  ;;  %1301 = vadd.xlane.f32.xlu0 %v1300_v32  ;;  %v825_v43 = vpop.xlane.xlu1 %824  ;;  %v645_v40 = vld [vmem:[%s3563_s6 + $0xf08] sm:$0xff] }
 0x129   : > { %v2000_v57 = vsel %vm1841_vm14, %v1999_v36, %v1995_v42  ;;  %v2008_v58 = vrot.slane %v825_v43, %v3738_v46  ;;  %v822_v59 = vpop.xlane.xlu0 %821  ;;  %v647_v36 = vld [vmem:[%s3563_s6 + $0xf18] sm:$0xff]  ;;  %v1396_v52 = vadd.f32 %v645_v40, %v644_v39 }
 0x12a   : > { %v3985_v62 = vsel %vm3028_vm15, %v2000_v57, %v3850_v50  ;;  %v2004_v63 = vrot.slane %v822_v59, %v3732_v44  ;;  %v522_v50 = vld [vmem:[%s3563_s6 + $0xb30] sm:$0xff]  ;;  %v1399_v42 = vadd.f32 %v647_v36, %v646_v35  ;;  %v401_v57 = vld [vmem:[%s3563_s6 + $0x768] sm:$0xff] }
 0x12b   : > { %1070 = vadd.xlane.f32.xlu1 %v1069_v41  ;;  %v1213_v17 = vadd.f32 %v523_v11, %v522_v50 }
 0x12c   : > { %v2009_v1 = vsel %vm1743_vm0, %v2008_v58, %v2004_v63  ;;  %1028 = vadd.xlane.f32.xlu0 %v1027_v49  ;;  %v831_v3 = vpop.xlane.xlu1 %830  ;;  %v367_v63 = vld [vmem:[%s3563_s6 + $0x658] sm:$0xff] }
 0x12d   : > { %v2018_v8 = vrot.slane %v831_v3, %v3735_v45  ;;  %v828_v10 = vpop.xlane.xlu0 %827  ;;  %v979_v5 = vadd.f32 %v367_v63, %v366_v61 }
 0x12e   : > { %v2013_v12 = vrot.slane %v828_v10, %v3741_v47 }
 0x12f   : > { %1163 = vadd.xlane.f32.xlu1 %v1162_v0 }
 0x130   : > { %v2014_v14 = vsel %vm1750_vm1, %v2013_v12, %v2009_v1  ;;  %1121 = vadd.xlane.f32.xlu0 %v1120_v4  ;;  %v837_v16 = vpop.xlane.xlu1 %836  ;;  %v1030_v1 = vadd.f32 %v401_v57, %v400_v56  ;;  %v428_v12 = vld [vmem:[%s3563_s6 + $0x840] sm:$0xff] }
 0x131   : > { %v2028_v24 = vrot.slane %v837_v16, %v3746_v54  ;;  %v2019_v21 = vsel %vm1757_vm2, %v2018_v8, %v2014_v14  ;;  %v834_v22 = vpop.xlane.xlu0 %833  ;;  %v463_v8 = vld [vmem:[%s3563_s6 + $0x958] sm:$0xff] }
 0x132   : > { %v2023_v28 = vrot.slane %v834_v22, %v3749_v55  ;;  %v1123_v16 = vadd.f32 %v463_v8, %v462_v6 }
 0x133   : > { %1253 = vadd.xlane.f32.xlu1 %v1252_v13  ;;  %v429_v13 = vld [vmem:[%s3563_s6 + $0x848] sm:$0xff] }
 0x134   : > { %v2024_v31 = vsel %vm1764_vm3, %v2023_v28, %v2019_v21  ;;  %1214 = vadd.xlane.f32.xlu0 %v1213_v17  ;;  %v843_v32 = vpop.xlane.xlu1 %842  ;;  %v1072_v19 = vadd.f32 %v429_v13, %v428_v12  ;;  %v525_v21 = vld [vmem:[%s3563_s6 + $0xb48] sm:$0xff]  ;;  %v490_v28 = vld [vmem:[%s3563_s6 + $0xa30] sm:$0xff] }
 0x135   : > { %v2038_v30 = vrot.slane %v843_v32, %v3765_v9  ;;  %v2029_v37 = vsel %vm1771_vm4, %v2028_v24, %v2024_v31  ;;  %v840_v38 = vpop.xlane.xlu0 %839  ;;  %v524_v24 = vld [vmem:[%s3563_s6 + $0xb40] sm:$0xff] }
 0x136   : > { %v2033_v41 = vrot.slane %v840_v38, %v3773_v15  ;;  %v1216_v32 = vadd.f32 %v525_v21, %v524_v24  ;;  %v430_v21 = vld [vmem:[%s3563_s6 + $0x850] sm:$0xff] }
 0x137   : > { %1307 = vadd.xlane.f32.xlu1 %v1306_v29  ;;  %v491_v29 = vld [vmem:[%s3563_s6 + $0xa38] sm:$0xff] }
 0x138   : > { %v2034_v43 = vsel %vm1778_vm5, %v2033_v41, %v2029_v37  ;;  %1256 = vadd.xlane.f32.xlu0 %v1255_v34  ;;  %v849_v49 = vpop.xlane.xlu1 %848  ;;  %v1165_v36 = vadd.f32 %v491_v29, %v490_v28  ;;  %v587_v37 = vld [vmem:[%s3563_s6 + $0xd38] sm:$0xff]  ;;  %v552_v41 = vld [vmem:[%s3563_s6 + $0xc20] sm:$0xff]  ;;  %v402_v29 = vld [vmem:[%s3563_s6 + $0x770] sm:$0xff] }
 0x139   : > { %v2048_v58 = vrot.slane %v849_v49, %v3782_v27  ;;  %v2039_v59 = vsel %vm1785_vm6, %v2038_v30, %v2034_v43  ;;  %v846_v60 = vpop.xlane.xlu0 %845  ;;  %v586_v30 = vld [vmem:[%s3563_s6 + $0xd30] sm:$0xff] }
 0x13a   : > { %v2043_v0 = vrot.slane %v846_v60, %v3789_v33  ;;  %v1309_v49 = vadd.f32 %v587_v37, %v586_v30  ;;  %v492_v37 = vld [vmem:[%s3563_s6 + $0xa40] sm:$0xff] }
 0x13b   : > { %1400 = vadd.xlane.f32.xlu1 %v1399_v42  ;;  %v553_v42 = vld [vmem:[%s3563_s6 + $0xc28] sm:$0xff] }
 0x13c   : > { %v2044_v3 = vsel %vm1792_vm7, %v2043_v0, %v2039_v59  ;;  %1397 = vadd.xlane.f32.xlu0 %v1396_v52  ;;  %v855_v4 = vpop.xlane.xlu1 %854  ;;  %v1258_v57 = vadd.f32 %v553_v42, %v552_v41  ;;  %v615_v59 = vld [vmem:[%s3563_s6 + $0xe18] sm:$0xff]  ;;  %v612_v0 = vld [vmem:[%s3563_s6 + $0xe00] sm:$0xff] }
 0x13d   : > { %v2058_v10 = vrot.slane %v855_v4, %v3798_v48  ;;  %v2049_v50 = vsel %vm1799_vm8, %v2048_v58, %v2044_v3  ;;  %v852_v11 = vpop.xlane.xlu0 %851  ;;  %v614_v58 = vld [vmem:[%s3563_s6 + $0xe10] sm:$0xff]  ;;  %v464_v42 = vld [vmem:[%s3563_s6 + $0x960] sm:$0xff] }
 0x13e   : > { %v2053_v14 = vrot.slane %v852_v11, %v3805_v53  ;;  %v369_v11 = vld [vmem:[%s3563_s6 + $0x668] sm:$0xff] }
 0x13f   : > { %1031 = vadd.xlane.f32.xlu1 %v1030_v1  ;;  %v613_v1 = vld [vmem:[%s3563_s6 + $0xe08] sm:$0xff] }
 0x140   : > { %v2054_v17 = vsel %vm1806_vm9, %v2053_v14, %v2049_v50  ;;  %980 = vadd.xlane.f32.xlu0 %v979_v5  ;;  %v861_v18 = vpop.xlane.xlu1 %860  ;;  %v1351_v5 = vadd.f32 %v615_v59, %v614_v58  ;;  %v368_v50 = vld [vmem:[%s3563_s6 + $0x660] sm:$0xff]  ;;  %v649_v14 = vld [vmem:[%s3563_s6 + $0xf28] sm:$0xff]  ;;  %v554_v59 = vld [vmem:[%s3563_s6 + $0xc30] sm:$0xff] }
 0x141   : > { %v2068_v22 = vrot.slane %v861_v18, %v3814_v2  ;;  %v2059_v25 = vsel %vm1813_vm10, %v2058_v10, %v2054_v17  ;;  %v858_v26 = vpop.xlane.xlu0 %857  ;;  %v1348_v10 = vadd.f32 %v613_v1, %v612_v0  ;;  %v982_v17 = vadd.f32 %v369_v11, %v368_v50  ;;  %v526_v1 = vld [vmem:[%s3563_s6 + $0xb50] sm:$0xff]  ;;  %v616_v11 = vld [vmem:[%s3563_s6 + $0xe20] sm:$0xff] }
 0x142   : > { %v2063_v31 = vrot.slane %v858_v26, %v3821_v7 }
 0x143   : > { %1124 = vadd.xlane.f32.xlu1 %v1123_v16 }
 0x144   : > { %v2064_v34 = vsel %vm1820_vm11, %v2063_v31, %v2059_v25  ;;  %1073 = vadd.xlane.f32.xlu0 %v1072_v19  ;;  %v867_v35 = vpop.xlane.xlu1 %866  ;;  %v403_v31 = vld [vmem:[%s3563_s6 + $0x778] sm:$0xff] }
 0x145   : > { %v2078_v38 = vrot.slane %v867_v35, %v3830_v20  ;;  %v2069_v39 = vsel %vm1827_vm12, %v2068_v22, %v2064_v34  ;;  %v864_v40 = vpop.xlane.xlu0 %863  ;;  %v431_v22 = vld [vmem:[%s3563_s6 + $0x858] sm:$0xff]  ;;  %v1033_v30 = vadd.f32 %v403_v31, %v402_v29 }
 0x146   : > { %v2073_v43 = vrot.slane %v864_v40, %v3836_v23  ;;  %v1075_v34 = vadd.f32 %v431_v22, %v430_v21 }
 0x147   : > { %1217 = vadd.xlane.f32.xlu1 %v1216_v32 }
 0x148   : > { %v2074_v52 = vsel %vm1834_vm13, %v2073_v43, %v2069_v39  ;;  %1166 = vadd.xlane.f32.xlu0 %v1165_v36  ;;  %v873_v56 = vpop.xlane.xlu1 %872  ;;  %v465_v43 = vld [vmem:[%s3563_s6 + $0x968] sm:$0xff] }
 0x149   : > { %v2079_v60 = vsel %vm1841_vm14, %v2078_v38, %v2074_v52  ;;  %v2087_v61 = vrot.slane %v873_v56, %v3738_v46  ;;  %v870_v63 = vpop.xlane.xlu0 %869  ;;  %v493_v38 = vld [vmem:[%s3563_s6 + $0xa48] sm:$0xff]  ;;  %v1126_v58 = vadd.f32 %v465_v43, %v464_v42 }
 0x14a   : > { %v4052_v3 = vsel %vm3028_vm15, %v2079_v60, %v3915_v51  ;;  %v2083_v4 = vrot.slane %v870_v63, %v3732_v44  ;;  %v648_v51 = vld [vmem:[%s3563_s6 + $0xf20] sm:$0xff]  ;;  %v1168_v52 = vadd.f32 %v493_v38, %v492_v37  ;;  %v555_v60 = vld [vmem:[%s3563_s6 + $0xc38] sm:$0xff]  ;;  %vm3030_vm15 = vcmask 1042434  }
 0x14b   : > { %1310 = vadd.xlane.f32.xlu1 %v1309_v49  ;;  %v1402_v24 = vadd.f32 %v649_v14, %v648_v51 }
 0x14c   : > { %v2088_v6 = vsel %vm1743_vm0, %v2087_v61, %v2083_v4  ;;  %1259 = vadd.xlane.f32.xlu0 %v1258_v57  ;;  %v879_v8 = vpop.xlane.xlu1 %878  ;;  %v527_v4 = vld [vmem:[%s3563_s6 + $0xb58] sm:$0xff] }
 0x14d   : > { %v2097_v12 = vrot.slane %v879_v8, %v3735_v45  ;;  %v876_v13 = vpop.xlane.xlu0 %875  ;;  %v1219_v50 = vadd.f32 %v527_v4, %v526_v1 }
 0x14e   : > { %v2092_v16 = vrot.slane %v876_v13, %v3741_v47 }
 0x14f   : > { %1352 = vadd.xlane.f32.xlu1 %v1351_v5 }
 0x150   : > { %v2093_v18 = vsel %vm1750_vm1, %v2092_v16, %v2088_v6  ;;  %1349 = vadd.xlane.f32.xlu0 %v1348_v10  ;;  %v885_v19 = vpop.xlane.xlu1 %884  ;;  %v1261_v6 = vadd.f32 %v555_v60, %v554_v59  ;;  %v588_v16 = vld [vmem:[%s3563_s6 + $0xd40] sm:$0xff] }
 0x151   : > { %v2107_v25 = vrot.slane %v885_v19, %v3746_v54  ;;  %v2098_v26 = vsel %vm1757_vm2, %v2097_v12, %v2093_v18  ;;  %v882_v28 = vpop.xlane.xlu0 %881  ;;  %v617_v12 = vld [vmem:[%s3563_s6 + $0xe28] sm:$0xff] }
 0x152   : > { %v2102_v32 = vrot.slane %v882_v28, %v3749_v55  ;;  %v1354_v19 = vadd.f32 %v617_v12, %v616_v11 }
 0x153   : > { %983 = vadd.xlane.f32.xlu1 %v982_v17  ;;  %v589_v17 = vld [vmem:[%s3563_s6 + $0xd48] sm:$0xff] }
 0x154   : > { %v2103_v35 = vsel %vm1764_vm3, %v2102_v32, %v2098_v26  ;;  %1403 = vadd.xlane.f32.xlu0 %v1402_v24  ;;  %v891_v36 = vpop.xlane.xlu1 %890  ;;  %v1312_v22 = vadd.f32 %v589_v17, %v588_v16  ;;  %v371_v26 = vld [vmem:[%s3563_s6 + $0x678] sm:$0xff]  ;;  %v650_v32 = vld [vmem:[%s3563_s6 + $0xf30] sm:$0xff] }
 0x155   : > { %v2117_v39 = vrot.slane %v891_v36, %v3765_v9  ;;  %v2108_v40 = vsel %vm1771_vm4, %v2107_v25, %v2103_v35  ;;  %v888_v41 = vpop.xlane.xlu0 %887  ;;  %v370_v25 = vld [vmem:[%s3563_s6 + $0x670] sm:$0xff] }
 0x156   : > { %v2112_v49 = vrot.slane %v888_v41, %v3773_v15  ;;  %v985_v36 = vadd.f32 %v371_v26, %v370_v25  ;;  %v618_v26 = vld [vmem:[%s3563_s6 + $0xe30] sm:$0xff] }
 0x157   : > { %1076 = vadd.xlane.f32.xlu1 %v1075_v34  ;;  %v651_v34 = vld [vmem:[%s3563_s6 + $0xf38] sm:$0xff] }
 0x158   : > { %v2113_v56 = vsel %vm1778_vm5, %v2112_v49, %v2108_v40  ;;  %1034 = vadd.xlane.f32.xlu0 %v1033_v30  ;;  %v897_v57 = vpop.xlane.xlu1 %896  ;;  %v1405_v38 = vadd.f32 %v651_v34, %v650_v32  ;;  %v433_v40 = vld [vmem:[%s3563_s6 + $0x868] sm:$0xff]  ;;  %v404_v49 = vld [vmem:[%s3563_s6 + $0x780] sm:$0xff]  ;;  %v590_v34 = vld [vmem:[%s3563_s6 + $0xd50] sm:$0xff] }
 0x159   : > { %v2127_v61 = vrot.slane %v897_v57, %v3782_v27  ;;  %v2118_v63 = vsel %vm1785_vm6, %v2117_v39, %v2113_v56  ;;  %v894_v0 = vpop.xlane.xlu0 %893  ;;  %v432_v39 = vld [vmem:[%s3563_s6 + $0x860] sm:$0xff] }
 0x15a   : > { %v2122_v5 = vrot.slane %v894_v0, %v3789_v33  ;;  %v1078_v57 = vadd.f32 %v433_v40, %v432_v39  ;;  %v372_v40 = vld [vmem:[%s3563_s6 + $0x680] sm:$0xff] }
 0x15b   : > { %1169 = vadd.xlane.f32.xlu1 %v1168_v52  ;;  %v405_v52 = vld [vmem:[%s3563_s6 + $0x788] sm:$0xff] }
 0x15c   : > { %v2123_v8 = vsel %vm1792_vm7, %v2122_v5, %v2118_v63  ;;  %1127 = vadd.xlane.f32.xlu0 %v1126_v58  ;;  %v903_v10 = vpop.xlane.xlu1 %902  ;;  %v1036_v60 = vadd.f32 %v405_v52, %v404_v49  ;;  %v495_v63 = vld [vmem:[%s3563_s6 + $0xa58] sm:$0xff]  ;;  %v466_v5 = vld [vmem:[%s3563_s6 + $0x970] sm:$0xff]  ;;  %v652_v52 = vld [vmem:[%s3563_s6 + $0xf40] sm:$0xff] }
 0x15d   : > { %v2137_v13 = vrot.slane %v903_v10, %v3798_v48  ;;  %v2128_v51 = vsel %vm1799_vm8, %v2127_v61, %v2123_v8  ;;  %v900_v14 = vpop.xlane.xlu0 %899  ;;  %v494_v61 = vld [vmem:[%s3563_s6 + $0xa50] sm:$0xff] }
 0x15e   : > { %v2132_v18 = vrot.slane %v900_v14, %v3805_v53  ;;  %v557_v14 = vld [vmem:[%s3563_s6 + $0xc48] sm:$0xff] }
 0x15f   : > { %1262 = vadd.xlane.f32.xlu1 %v1261_v6  ;;  %v467_v6 = vld [vmem:[%s3563_s6 + $0x978] sm:$0xff] }
 0x160   : > { %v2133_v24 = vsel %vm1806_vm9, %v2132_v18, %v2128_v51  ;;  %1220 = vadd.xlane.f32.xlu0 %v1219_v50  ;;  %v909_v21 = vpop.xlane.xlu1 %908  ;;  %v1171_v50 = vadd.f32 %v495_v63, %v494_v61  ;;  %v556_v51 = vld [vmem:[%s3563_s6 + $0xc40] sm:$0xff]  ;;  %v434_v63 = vld [vmem:[%s3563_s6 + $0x870] sm:$0xff] }
 0x161   : > { %v2147_v28 = vrot.slane %v909_v21, %v3814_v2  ;;  %v2138_v29 = vsel %vm1813_vm10, %v2137_v13, %v2133_v24  ;;  %v906_v31 = vpop.xlane.xlu0 %905  ;;  %v1129_v13 = vadd.f32 %v467_v6, %v466_v5  ;;  %v528_v18 = vld [vmem:[%s3563_s6 + $0xb60] sm:$0xff]  ;;  %v1264_v24 = vadd.f32 %v557_v14, %v556_v51  ;;  %v406_v6 = vld [vmem:[%s3563_s6 + $0x790] sm:$0xff] }
 0x162   : > { %v2142_v35 = vrot.slane %v906_v31, %v3821_v7  ;;  %v496_v14 = vld [vmem:[%s3563_s6 + $0xa60] sm:$0xff] }
 0x163   : > { %1355 = vadd.xlane.f32.xlu1 %v1354_v19  ;;  %v529_v19 = vld [vmem:[%s3563_s6 + $0xb68] sm:$0xff] }
 0x164   : > { %v2143_v30 = vsel %vm1820_vm11, %v2142_v35, %v2138_v29  ;;  %1313 = vadd.xlane.f32.xlu0 %v1312_v22  ;;  %v915_v37 = vpop.xlane.xlu1 %914  ;;  %v1222_v25 = vadd.f32 %v529_v19, %v528_v18  ;;  %v591_v35 = vld [vmem:[%s3563_s6 + $0xd58] sm:$0xff] }
 0x165   : > { %v2157_v41 = vrot.slane %v915_v37, %v3830_v20  ;;  %v2148_v42 = vsel %vm1827_vm12, %v2147_v28, %v2143_v30  ;;  %v912_v43 = vpop.xlane.xlu0 %911  ;;  %v619_v28 = vld [vmem:[%s3563_s6 + $0xe38] sm:$0xff]  ;;  %v1315_v39 = vadd.f32 %v591_v35, %v590_v34 }
 0x166   : > { %v2152_v56 = vrot.slane %v912_v43, %v3836_v23  ;;  %v1357_v30 = vadd.f32 %v619_v28, %v618_v26 }
 0x167   : > { %986 = vadd.xlane.f32.xlu1 %v985_v36 }
 0x168   : > { %v2153_v58 = vsel %vm1834_vm13, %v2152_v56, %v2148_v42  ;;  %1406 = vadd.xlane.f32.xlu0 %v1405_v38  ;;  %v921_v59 = vpop.xlane.xlu1 %920  ;;  %v653_v56 = vld [vmem:[%s3563_s6 + $0xf48] sm:$0xff] }
 0x169   : > { %v2158_v0 = vsel %vm1841_vm14, %v2157_v41, %v2153_v58  ;;  %v2166_v1 = vrot.slane %v921_v59, %v3738_v46  ;;  %v918_v4 = vpop.xlane.xlu0 %917  ;;  %v373_v41 = vld [vmem:[%s3563_s6 + $0x688] sm:$0xff]  ;;  %v1408_v61 = vadd.f32 %v653_v56, %v652_v52 }
 0x16a   : > { %v2162_v8 = vrot.slane %v918_v4, %v3732_v44  ;;  %v4120_v10 = vsel %vm3030_vm15, %v2158_v0, %v3985_v62  ;;  %v988_v58 = vadd.f32 %v373_v41, %v372_v40  ;;  %v435_v0 = vld [vmem:[%s3563_s6 + $0x878] sm:$0xff] }
 0x16b   : > { %1079 = vadd.xlane.f32.xlu1 %v1078_v57 }
 0x16c   : > { %v2167_v11 = vsel %vm1743_vm0, %v2166_v1, %v2162_v8  ;;  %1037 = vadd.xlane.f32.xlu0 %v1036_v60  ;;  %v927_v12 = vpop.xlane.xlu1 %926  ;;  %v407_v8 = vld [vmem:[%s3563_s6 + $0x798] sm:$0xff] }
 0x16d   : > { %v2176_v16 = vrot.slane %v927_v12, %v3735_v45  ;;  %v924_v17 = vpop.xlane.xlu0 %923  ;;  %v1039_v51 = vadd.f32 %v407_v8, %v406_v6 }
 0x16e   : > { %v2171_v62 = vrot.slane %v924_v17, %v3741_v47 }
 0x16f   : > { %1172 = vadd.xlane.f32.xlu1 %v1171_v50 }
 0x170   : > { %v2172_v21 = vsel %vm1750_vm1, %v2171_v62, %v2167_v11  ;;  %1130 = vadd.xlane.f32.xlu0 %v1129_v13  ;;  %v933_v22 = vpop.xlane.xlu1 %932  ;;  %v1081_v11 = vadd.f32 %v435_v0, %v434_v63  ;;  %v468_v62 = vld [vmem:[%s3563_s6 + $0x980] sm:$0xff] }
 0x171   : > { %v2186_v29 = vrot.slane %v933_v22, %v3746_v54  ;;  %v2177_v31 = vsel %vm1757_vm2, %v2176_v16, %v2172_v21  ;;  %v930_v32 = vpop.xlane.xlu0 %929  ;;  %v497_v16 = vld [vmem:[%s3563_s6 + $0xa68] sm:$0xff] }
 0x172   : > { %v2181_v36 = vrot.slane %v930_v32, %v3749_v55  ;;  %v1174_v22 = vadd.f32 %v497_v16, %v496_v14 }
 0x173   : > { %1265 = vadd.xlane.f32.xlu1 %v1264_v24  ;;  %v469_v24 = vld [vmem:[%s3563_s6 + $0x988] sm:$0xff] }
 0x174   : > { %v2182_v37 = vsel %vm1764_vm3, %v2181_v36, %v2177_v31  ;;  %1223 = vadd.xlane.f32.xlu0 %v1222_v25  ;;  %v939_v38 = vpop.xlane.xlu1 %938  ;;  %v1132_v28 = vadd.f32 %v469_v24, %v468_v62  ;;  %v559_v31 = vld [vmem:[%s3563_s6 + $0xc58] sm:$0xff]  ;;  %v530_v36 = vld [vmem:[%s3563_s6 + $0xb70] sm:$0xff] }
 0x175   : > { %v2196_v42 = vrot.slane %v939_v38, %v3765_v9  ;;  %v2187_v43 = vsel %vm1771_vm4, %v2186_v29, %v2182_v37  ;;  %v936_v49 = vpop.xlane.xlu0 %935  ;;  %v558_v29 = vld [vmem:[%s3563_s6 + $0xc50] sm:$0xff] }
 0x176   : > { %v2191_v57 = vrot.slane %v936_v49, %v3773_v15  ;;  %v1267_v38 = vadd.f32 %v559_v31, %v558_v29  ;;  %v498_v31 = vld [vmem:[%s3563_s6 + $0xa70] sm:$0xff] }
 0x177   : > { %1358 = vadd.xlane.f32.xlu1 %v1357_v30  ;;  %v531_v30 = vld [vmem:[%s3563_s6 + $0xb78] sm:$0xff] }
 0x178   : > { %v2192_v59 = vsel %vm1778_vm5, %v2191_v57, %v2187_v43  ;;  %1316 = vadd.xlane.f32.xlu0 %v1315_v39  ;;  %v945_v60 = vpop.xlane.xlu1 %944  ;;  %v1225_v41 = vadd.f32 %v531_v30, %v530_v36  ;;  %v621_v43 = vld [vmem:[%s3563_s6 + $0xe48] sm:$0xff]  ;;  %v592_v57 = vld [vmem:[%s3563_s6 + $0xd60] sm:$0xff]  ;;  %v470_v36 = vld [vmem:[%s3563_s6 + $0x990] sm:$0xff] }
 0x179   : > { %v2206_v1 = vrot.slane %v945_v60, %v3782_v27  ;;  %v2197_v4 = vsel %vm1785_vm6, %v2196_v42, %v2192_v59  ;;  %v942_v5 = vpop.xlane.xlu0 %941  ;;  %v620_v42 = vld [vmem:[%s3563_s6 + $0xe40] sm:$0xff]  ;;  %v471_v30 = vld [vmem:[%s3563_s6 + $0x998] sm:$0xff] }
 0x17a   : > { %v2201_v50 = vrot.slane %v942_v5, %v3789_v33  ;;  %v1360_v60 = vadd.f32 %v621_v43, %v620_v42  ;;  %v560_v42 = vld [vmem:[%s3563_s6 + $0xc60] sm:$0xff]  ;;  %v561_v43 = vld [vmem:[%s3563_s6 + $0xc68] sm:$0xff] }
 0x17b   : > { %989 = vadd.xlane.f32.xlu1 %v988_v58  ;;  %v593_v58 = vld [vmem:[%s3563_s6 + $0xd68] sm:$0xff] }
 0x17c   : > { %v2202_v12 = vsel %vm1792_vm7, %v2201_v50, %v2197_v4  ;;  %1409 = vadd.xlane.f32.xlu0 %v1408_v61  ;;  %v951_v13 = vpop.xlane.xlu1 %950  ;;  %v1318_v0 = vadd.f32 %v593_v58, %v592_v57  ;;  %v375_v4 = vld [vmem:[%s3563_s6 + $0x698] sm:$0xff]  ;;  %v654_v50 = vld [vmem:[%s3563_s6 + $0xf50] sm:$0xff]  ;;  %v533_v57 = vld [vmem:[%s3563_s6 + $0xb88] sm:$0xff] }
 0x17d   : > { %v2216_v17 = vrot.slane %v951_v13, %v3798_v48  ;;  %v2207_v18 = vsel %vm1799_vm8, %v2206_v1, %v2202_v12  ;;  %v948_v19 = vpop.xlane.xlu0 %947  ;;  %v374_v1 = vld [vmem:[%s3563_s6 + $0x690] sm:$0xff] }
 0x17e   : > { %v2211_v21 = vrot.slane %v948_v19, %v3805_v53  ;;  %v437_v19 = vld [vmem:[%s3563_s6 + $0x888] sm:$0xff] }
 0x17f   : > { %1082 = vadd.xlane.f32.xlu1 %v1081_v11  ;;  %v655_v11 = vld [vmem:[%s3563_s6 + $0xf58] sm:$0xff] }
 0x180   : > { %v2212_v25 = vsel %vm1806_vm9, %v2211_v21, %v2207_v18  ;;  %1040 = vadd.xlane.f32.xlu0 %v1039_v51  ;;  %v957_v26 = vpop.xlane.xlu1 %956  ;;  %v991_v51 = vadd.f32 %v375_v4, %v374_v1  ;;  %v436_v18 = vld [vmem:[%s3563_s6 + $0x880] sm:$0xff]  ;;  %v622_v1 = vld [vmem:[%s3563_s6 + $0xe50] sm:$0xff]  ;;  %v623_v4 = vld [vmem:[%s3563_s6 + $0xe58] sm:$0xff] }
 0x181   : > { %v2226_v32 = vrot.slane %v957_v26, %v3814_v2  ;;  %v2217_v34 = vsel %vm1813_vm10, %v2216_v17, %v2212_v25  ;;  %v954_v35 = vpop.xlane.xlu0 %953  ;;  %v1411_v17 = vadd.f32 %v655_v11, %v654_v50  ;;  %v408_v21 = vld [vmem:[%s3563_s6 + $0x7a0] sm:$0xff]  ;;  %v1084_v25 = vadd.f32 %v437_v19, %v436_v18  ;;  %v594_v50 = vld [vmem:[%s3563_s6 + $0xd70] sm:$0xff]  ;;  %v595_v11 = vld [vmem:[%s3563_s6 + $0xd78] sm:$0xff] }
 0x182   : > { %v2221_v37 = vrot.slane %v954_v35, %v3821_v7  ;;  %v376_v18 = vld [vmem:[%s3563_s6 + $0x6a0] sm:$0xff]  ;;  %v377_v19 = vld [vmem:[%s3563_s6 + $0x6a8] sm:$0xff] }
 0x183   : > { %1175 = vadd.xlane.f32.xlu1 %v1174_v22  ;;  %v409_v22 = vld [vmem:[%s3563_s6 + $0x7a8] sm:$0xff] }
 0x184   : > { %v2222_v39 = vsel %vm1820_vm11, %v2221_v37, %v2217_v34  ;;  %1133 = vadd.xlane.f32.xlu0 %v1132_v28  ;;  %v963_v40 = vpop.xlane.xlu1 %962  ;;  %v1042_v29 = vadd.f32 %v409_v22, %v408_v21  ;;  %v657_v21 = vld [vmem:[%s3563_s6 + $0xf68] sm:$0xff] }
 0x185   : > { %v2236_v49 = vrot.slane %v963_v40, %v3830_v20  ;;  %v2227_v52 = vsel %vm1827_vm12, %v2226_v32, %v2222_v39  ;;  %v960_v56 = vpop.xlane.xlu0 %959  ;;  %v499_v32 = vld [vmem:[%s3563_s6 + $0xa78] sm:$0xff] }
 0x186   : > { %v2231_v59 = vrot.slane %v960_v56, %v3836_v23  ;;  %v532_v56 = vld [vmem:[%s3563_s6 + $0xb80] sm:$0xff] }
 0x187   : > { %1268 = vadd.xlane.f32.xlu1 %v1267_v38  ;;  %v1177_v38 = vadd.f32 %v499_v32, %v498_v31  ;;  %v439_v31 = vld [vmem:[%s3563_s6 + $0x898] sm:$0xff] }
 0x188   : > { %v2232_v61 = vsel %vm1834_vm13, %v2231_v59, %v2227_v52  ;;  %1226 = vadd.xlane.f32.xlu0 %v1225_v41  ;;  %v969_v63 = vpop.xlane.xlu1 %968  ;;  %v1135_v41 = vadd.f32 %v471_v30, %v470_v36  ;;  %v411_v36 = vld [vmem:[%s3563_s6 + $0x7b8] sm:$0xff] }
 0x189   : > { %v2237_v5 = vsel %vm1841_vm14, %v2236_v49, %v2232_v61  ;;  %v2245_v6 = vrot.slane %v969_v63, %v3738_v46  ;;  %v966_v8 = vpop.xlane.xlu0 %965 }
 0x18a   : > { %v2241_v12 = vrot.slane %v966_v8, %v3732_v44  ;;  %v4187_v13 = vsel %vm3030_vm15, %v2237_v5, %v4052_v3 }
 0x18b   : > { %1361 = vadd.xlane.f32.xlu1 %v1360_v60  ;;  %v1270_v60 = vadd.f32 %v561_v43, %v560_v42 }
 0x18c   : > { %v2246_v14 = vsel %vm1743_vm0, %v2245_v6, %v2241_v12  ;;  %1319 = vadd.xlane.f32.xlu0 %v1318_v0  ;;  %v975_v16 = vpop.xlane.xlu1 %974  ;;  %v1228_v0 = vadd.f32 %v533_v57, %v532_v56 }
 0x18d   : > { %v2255_v62 = vrot.slane %v975_v16, %v3735_v45  ;;  %v972_v24 = vpop.xlane.xlu0 %971 }
 0x18e   : > { %v2250_v3 = vrot.slane %v972_v24, %v3741_v47  ;;  %v656_v24 = vld [vmem:[%s3563_s6 + $0xf60] sm:$0xff] }
 0x18f   : > { %992 = vadd.xlane.f32.xlu1 %v991_v51  ;;  %v1363_v51 = vadd.f32 %v623_v4, %v622_v1  ;;  %v562_v4 = vld [vmem:[%s3563_s6 + $0xc70] sm:$0xff] }
 0x190   : > { %v2251_v26 = vsel %vm1750_vm1, %v2250_v3, %v2246_v14  ;;  %1412 = vadd.xlane.f32.xlu0 %v1411_v17  ;;  %v1014_v28 = vpop.xlane.xlu1 %1013  ;;  %v1321_v17 = vadd.f32 %v595_v11, %v594_v50  ;;  %v994_v3 = vadd.f32 %v377_v19, %v376_v18  ;;  %v534_v50 = vld [vmem:[%s3563_s6 + $0xb90] sm:$0xff]  ;;  %v535_v11 = vld [vmem:[%s3563_s6 + $0xb98] sm:$0xff]  ;;  %v624_v19 = vld [vmem:[%s3563_s6 + $0xe60] sm:$0xff] }
 0x191   : > { %v2256_v34 = vsel %vm1757_vm2, %v2255_v62, %v2251_v26  ;;  %v978_v35 = vpop.xlane.xlu0 %977  ;;  %v2320_v58 = vrot.slane %v1014_v28, %v3732_v44  ;;  %v1414_v28 = vadd.f32 %v657_v21, %v656_v24  ;;  %v1231_v18 = vadd.f32 %v535_v11, %v534_v50  ;;  %v596_v21 = vld [vmem:[%s3563_s6 + $0xd80] sm:$0xff]  ;;  %v474_v11 = vld [vmem:[%s3563_s6 + $0x9b0] sm:$0xff] }
 0x192   : > { %v2260_v37 = vrot.slane %v978_v35, %v3749_v55  ;;  %v410_v35 = vld [vmem:[%s3563_s6 + $0x7b0] sm:$0xff] }
 0x193   : > { %1085 = vadd.xlane.f32.xlu1 %v1084_v25  ;;  %v1045_v43 = vadd.f32 %v411_v36, %v410_v35  ;;  %v658_v36 = vld [vmem:[%s3563_s6 + $0xf70] sm:$0xff] }
 0x194   : > { %v4204_v39 = vsel %vm1764_vm3, %v2260_v37, %v2256_v34  ;;  %1043 = vadd.xlane.f32.xlu0 %v1042_v29  ;;  %v1020_v40 = vpop.xlane.xlu1 %1019  ;;  %v438_v29 = vld [vmem:[%s3563_s6 + $0x890] sm:$0xff] }
 0x195   : > { %v2329_v49 = vrot.slane %v1020_v40, %v3741_v47  ;;  %v1017_v52 = vpop.xlane.xlu0 %1016  ;;  %v1087_v40 = vadd.f32 %v439_v31, %v438_v29  ;;  %v378_v31 = vld [vmem:[%s3563_s6 + $0x6b0] sm:$0xff] }
 0x196   : > { %v2324_v59 = vrot.slane %v1017_v52, %v3738_v46  ;;  %v501_v52 = vld [vmem:[%s3563_s6 + $0xa88] sm:$0xff] }
 0x197   : > { %1178 = vadd.xlane.f32.xlu1 %v1177_v38 }
 0x198   : > { %v2325_v61 = vsel %vm1743_vm0, %v2324_v59, %v2320_v58  ;;  %1136 = vadd.xlane.f32.xlu0 %v1135_v41  ;;  %v1113_v63 = vpop.xlane.xlu1 %1112  ;;  %v472_v58 = vld [vmem:[%s3563_s6 + $0x9a0] sm:$0xff]  ;;  %v473_v59 = vld [vmem:[%s3563_s6 + $0x9a8] sm:$0xff] }
 0x199   : > { %v2482_v5 = vrot.slane %v1113_v63, %v3738_v46  ;;  %v1110_v6 = vpop.xlane.xlu0 %1109  ;;  %v2330_v8 = vsel %vm1750_vm1, %v2329_v49, %v2325_v61  ;;  %v500_v49 = vld [vmem:[%s3563_s6 + $0xa80] sm:$0xff]  ;;  %v1138_v1 = vadd.f32 %v473_v59, %v472_v58 }
 0x19a   : > { %v2478_v12 = vrot.slane %v1110_v6, %v3732_v44  ;;  %v1180_v61 = vadd.f32 %v501_v52, %v500_v49  ;;  %v440_v52 = vld [vmem:[%s3563_s6 + $0x8a0] sm:$0xff] }
 0x19b   : > { %1271 = vadd.xlane.f32.xlu1 %v1270_v60  ;;  %v412_v59 = vld [vmem:[%s3563_s6 + $0x7c0] sm:$0xff] }
 0x19c   : > { %v2483_v14 = vsel %vm1743_vm0, %v2482_v5, %v2478_v12  ;;  %1229 = vadd.xlane.f32.xlu0 %v1228_v0  ;;  %v1062_v16 = vpop.xlane.xlu1 %1061  ;;  %v563_v5 = vld [vmem:[%s3563_s6 + $0xc78] sm:$0xff] }
 0x19d   : > { %v1023_v62 = vpop.xlane.xlu0 %1022  ;;  %v2399_v30 = vrot.slane %v1062_v16, %v3732_v44 }
 0x19e   : > { %v2334_v22 = vrot.slane %v1023_v62, %v3735_v45  ;;  %v625_v62 = vld [vmem:[%s3563_s6 + $0xe68] sm:$0xff] }
 0x19f   : > { %1364 = vadd.xlane.f32.xlu1 %v1363_v51 }
 0x1a0   : > { %v2335_v25 = vsel %vm1757_vm2, %v2334_v22, %v2330_v8  ;;  %1322 = vadd.xlane.f32.xlu0 %v1321_v17  ;;  %v1116_v26 = vpop.xlane.xlu1 %1115  ;;  %v597_v22 = vld [vmem:[%s3563_s6 + $0xd88] sm:$0xff] }
 0x1a1   : > { %v2487_v32 = vrot.slane %v1116_v26, %v3741_v47  ;;  %v1065_v34 = vpop.xlane.xlu0 %1064  ;;  %v1366_v26 = vadd.f32 %v625_v62, %v624_v19  ;;  %v1324_v29 = vadd.f32 %v597_v22, %v596_v21  ;;  %v564_v21 = vld [vmem:[%s3563_s6 + $0xc80] sm:$0xff]  ;;  %v565_v22 = vld [vmem:[%s3563_s6 + $0xc88] sm:$0xff] }
 0x1a2   : > { %v2403_v37 = vrot.slane %v1065_v34, %v3738_v46 }
 0x1a3   : > { %v2488_v38 = vsel %vm1750_vm1, %v2487_v32, %v2483_v14  ;;  %995 = vadd.xlane.f32.xlu1 %v994_v3  ;;  %v1273_v14 = vadd.f32 %v563_v5, %v562_v4  ;;  %v379_v32 = vld [vmem:[%s3563_s6 + $0x6b8] sm:$0xff]  ;;  %v502_v5 = vld [vmem:[%s3563_s6 + $0xa90] sm:$0xff] }
 0x1a4   : > { %v2404_v41 = vsel %vm1743_vm0, %v2403_v37, %v2399_v30  ;;  %1415 = vadd.xlane.f32.xlu0 %v1414_v28  ;;  %v1209_v42 = vpop.xlane.xlu1 %1208  ;;  %v659_v30 = vld [vmem:[%s3563_s6 + $0xf78] sm:$0xff] }
 0x1a5   : > { %v2640_v56 = vrot.slane %v1209_v42, %v3738_v46  ;;  %v1206_v57 = vpop.xlane.xlu0 %1205  ;;  %v1417_v49 = vadd.f32 %v659_v30, %v658_v36  ;;  %v626_v36 = vld [vmem:[%s3563_s6 + $0xe70] sm:$0xff]  ;;  %v627_v30 = vld [vmem:[%s3563_s6 + $0xe78] sm:$0xff] }
 0x1a6   : > { %v2636_v60 = vrot.slane %v1206_v57, %v3732_v44 }
 0x1a7   : > { %1088 = vadd.xlane.f32.xlu1 %v1087_v40 }
 0x1a8   : > { %v2641_v63 = vsel %vm1743_vm0, %v2640_v56, %v2636_v60  ;;  %1046 = vadd.xlane.f32.xlu0 %v1045_v43  ;;  %v1068_v0 = vpop.xlane.xlu1 %1067  ;;  %v441_v56 = vld [vmem:[%s3563_s6 + $0x8a8] sm:$0xff] }
 0x1a9   : > { %v2408_v6 = vrot.slane %v1068_v0, %v3741_v47  ;;  %v1026_v8 = vpop.xlane.xlu0 %1025  ;;  %v413_v60 = vld [vmem:[%s3563_s6 + $0x7c8] sm:$0xff] }
 0x1aa   : > { %v2339_v12 = vrot.slane %v1026_v8, %v3749_v55  ;;  %v1048_v4 = vadd.f32 %v413_v60, %v412_v59  ;;  %v660_v60 = vld [vmem:[%s3563_s6 + $0xf80] sm:$0xff] }
 0x1ab   : > { %v2409_v51 = vsel %vm1750_vm1, %v2408_v6, %v2404_v41  ;;  %1181 = vadd.xlane.f32.xlu1 %v1180_v61  ;;  %v997_v41 = vadd.f32 %v379_v32, %v378_v31  ;;  %v503_v6 = vld [vmem:[%s3563_s6 + $0xa98] sm:$0xff] }
 0x1ac   : > { %v2340_v16 = vsel %vm1764_vm3, %v2339_v12, %v2335_v25  ;;  %1139 = vadd.xlane.f32.xlu0 %v1138_v1  ;;  %v1158_v17 = vpop.xlane.xlu1 %1157  ;;  %v475_v12 = vld [vmem:[%s3563_s6 + $0x9b8] sm:$0xff] }
 0x1ad   : > { %v1119_v24 = vpop.xlane.xlu0 %1118  ;;  %v2557_v37 = vrot.slane %v1158_v17, %v3732_v44 }
 0x1ae   : > { %v2492_v3 = vrot.slane %v1119_v24, %v3735_v45  ;;  %v1141_v24 = vadd.f32 %v475_v12, %v474_v11  ;;  %v443_v11 = vld [vmem:[%s3563_s6 + $0x8b8] sm:$0xff] }
 0x1af   : > { %1274 = vadd.xlane.f32.xlu1 %v1273_v14 }
 0x1b0   : > { %v2493_v28 = vsel %vm1757_vm2, %v2492_v3, %v2488_v38  ;;  %1232 = vadd.xlane.f32.xlu0 %v1231_v18  ;;  %v1212_v25 = vpop.xlane.xlu1 %1211  ;;  %v1183_v18 = vadd.f32 %v503_v6, %v502_v5 }
 0x1b1   : > { %v2645_v34 = vrot.slane %v1212_v25, %v3741_v47  ;;  %v1161_v35 = vpop.xlane.xlu0 %1160  ;;  %v536_v25 = vld [vmem:[%s3563_s6 + $0xba0] sm:$0xff] }
 0x1b2   : > { %v2561_v40 = vrot.slane %v1161_v35, %v3738_v46 }
 0x1b3   : > { %v2646_v38 = vsel %vm1750_vm1, %v2645_v34, %v2641_v63  ;;  %1367 = vadd.xlane.f32.xlu1 %v1366_v26  ;;  %v1090_v63 = vadd.f32 %v441_v56, %v440_v52  ;;  %v380_v56 = vld [vmem:[%s3563_s6 + $0x6c0] sm:$0xff] }
 0x1b4   : > { %v2562_v42 = vsel %vm1743_vm0, %v2561_v40, %v2557_v37  ;;  %1325 = vadd.xlane.f32.xlu0 %v1324_v29  ;;  %v1305_v43 = vpop.xlane.xlu1 %1304  ;;  %v598_v40 = vld [vmem:[%s3563_s6 + $0xd90] sm:$0xff] }
 0x1b5   : > { %v2798_v57 = vrot.slane %v1305_v43, %v3738_v46  ;;  %v1302_v58 = vpop.xlane.xlu0 %1301  ;;  %v1369_v43 = vadd.f32 %v627_v30, %v626_v36 }
 0x1b6   : > { %v2794_v61 = vrot.slane %v1302_v58, %v3732_v44 }
 0x1b7   : > { %998 = vadd.xlane.f32.xlu1 %v997_v41  ;;  %v599_v41 = vld [vmem:[%s3563_s6 + $0xd98] sm:$0xff] }
 0x1b8   : > { %v2799_v0 = vsel %vm1743_vm0, %v2798_v57, %v2794_v61  ;;  %1418 = vadd.xlane.f32.xlu0 %v1417_v49  ;;  %v1071_v1 = vpop.xlane.xlu1 %1070  ;;  %v1327_v52 = vadd.f32 %v599_v41, %v598_v40  ;;  %v381_v57 = vld [vmem:[%s3563_s6 + $0x6c8] sm:$0xff] }
 0x1b9   : > { %v2413_v8 = vrot.slane %v1071_v1, %v3735_v45  ;;  %v1029_v50 = vpop.xlane.xlu0 %1028  ;;  %v661_v61 = vld [vmem:[%s3563_s6 + $0xf88] sm:$0xff] }
 0x1ba   : > { %v2344_v14 = vrot.slane %v1029_v50, %v3746_v54  ;;  %v442_v50 = vld [vmem:[%s3563_s6 + $0x8b0] sm:$0xff] }
 0x1bb   : > { %v4281_v17 = vsel %vm1757_vm2, %v2413_v8, %v2409_v51  ;;  %1091 = vadd.xlane.f32.xlu1 %v1090_v63  ;;  %v537_v51 = vld [vmem:[%s3563_s6 + $0xba8] sm:$0xff]  ;;  %v1420_v8 = vadd.f32 %v661_v61, %v660_v60 }
 0x1bc   : > { %v4284_v19 = vsel %vm1771_vm4, %v2344_v14, %v2340_v16  ;;  %1049 = vadd.xlane.f32.xlu0 %v1048_v4  ;;  %v1164_v62 = vpop.xlane.xlu1 %1163  ;;  %v1276_v16 = vadd.f32 %v565_v22, %v564_v21  ;;  %v1234_v35 = vadd.f32 %v537_v51, %v536_v25  ;;  %v1000_v4 = vadd.f32 %v381_v57, %v380_v56  ;;  %v505_v25 = vld [vmem:[%s3563_s6 + $0xaa8] sm:$0xff]  ;;  %v539_v56 = vld [vmem:[%s3563_s6 + $0xbb8] sm:$0xff] }
 0x1bd   : > { %v2566_v3 = vrot.slane %v1164_v62, %v3741_v47  ;;  %v1122_v26 = vpop.xlane.xlu0 %1121 }
 0x1be   : > { %v2497_v29 = vrot.slane %v1122_v26, %v3749_v55  ;;  %v504_v26 = vld [vmem:[%s3563_s6 + $0xaa0] sm:$0xff] }
 0x1bf   : > { %v4293_v31 = vsel %vm1750_vm1, %v2566_v3, %v2562_v42  ;;  %1184 = vadd.xlane.f32.xlu1 %v1183_v18  ;;  %v414_v18 = vld [vmem:[%s3563_s6 + $0x7d0] sm:$0xff]  ;;  %v1186_v30 = vadd.f32 %v505_v25, %v504_v26 }
 0x1c0   : > { %v4296_v32 = vsel %vm1764_vm3, %v2497_v29, %v2493_v28  ;;  %1142 = vadd.xlane.f32.xlu0 %v1141_v24  ;;  %v1254_v34 = vpop.xlane.xlu1 %1253  ;;  %v1093_v24 = vadd.f32 %v443_v11, %v442_v50 }
 0x1c1   : > { %v1215_v37 = vpop.xlane.xlu0 %1214  ;;  %v2715_v63 = vrot.slane %v1254_v34, %v3732_v44  ;;  %v477_v34 = vld [vmem:[%s3563_s6 + $0x9c8] sm:$0xff] }
 0x1c2   : > { %v2650_v42 = vrot.slane %v1215_v37, %v3735_v45 }
 0x1c3   : > { %1277 = vadd.xlane.f32.xlu1 %v1276_v16  ;;  %v476_v16 = vld [vmem:[%s3563_s6 + $0x9c0] sm:$0xff] }
 0x1c4   : > { %v4304_v49 = vsel %vm1757_vm2, %v2650_v42, %v2646_v38  ;;  %1235 = vadd.xlane.f32.xlu0 %v1234_v35  ;;  %v1308_v28 = vpop.xlane.xlu1 %1307  ;;  %v1144_v41 = vadd.f32 %v477_v34, %v476_v16  ;;  %v566_v42 = vld [vmem:[%s3563_s6 + $0xc90] sm:$0xff]  ;;  %v444_v34 = vld [vmem:[%s3563_s6 + $0x8c0] sm:$0xff] }
 0x1c5   : > { %v2803_v58 = vrot.slane %v1308_v28, %v3741_v47  ;;  %v1257_v59 = vpop.xlane.xlu0 %1256 }
 0x1c6   : > { %v2719_v1 = vrot.slane %v1257_v59, %v3738_v46 }
 0x1c7   : > { %v4314_v38 = vsel %vm1750_vm1, %v2803_v58, %v2799_v0  ;;  %1370 = vadd.xlane.f32.xlu1 %v1369_v43  ;;  %v415_v0 = vld [vmem:[%s3563_s6 + $0x7d8] sm:$0xff] }
 0x1c8   : > { %v4317_v5 = vsel %vm1743_vm0, %v2719_v1, %v2715_v63  ;;  %1328 = vadd.xlane.f32.xlu0 %v1327_v52  ;;  %v1401_v6 = vpop.xlane.xlu1 %1400  ;;  %v1051_v3 = vadd.f32 %v415_v0, %v414_v18  ;;  %v567_v43 = vld [vmem:[%s3563_s6 + $0xc98] sm:$0xff]  ;;  %v628_v63 = vld [vmem:[%s3563_s6 + $0xe80] sm:$0xff]  ;;  %v629_v1 = vld [vmem:[%s3563_s6 + $0xe88] sm:$0xff] }
 0x1c9   : > { %v2956_v12 = vrot.slane %v1401_v6, %v3738_v46  ;;  %v1398_v14 = vpop.xlane.xlu0 %1397  ;;  %v1279_v58 = vadd.f32 %v567_v43, %v566_v42  ;;  %v1372_v11 = vadd.f32 %v629_v1, %v628_v63  ;;  %v382_v0 = vld [vmem:[%s3563_s6 + $0x6d0] sm:$0xff] }
 0x1ca   : > { %v2952_v62 = vrot.slane %v1398_v14, %v3732_v44 }
 0x1cb   : > { %1001 = vadd.xlane.f32.xlu1 %v1000_v4 }
 0x1cc   : > { %v4326_v21 = vsel %vm1743_vm0, %v2956_v12, %v2952_v62  ;;  %1421 = vadd.xlane.f32.xlu0 %v1420_v8  ;;  %v1032_v22 = vpop.xlane.xlu1 %1031  ;;  %v601_v8 = vld [vmem:[%s3563_s6 + $0xda8] sm:$0xff]  ;;  %v383_v62 = vld [vmem:[%s3563_s6 + $0x6d8] sm:$0xff] }
 0x1cd   : > { %v2349_v51 = vrot.slane %v1032_v22, %v3773_v15  ;;  %v981_v29 = vpop.xlane.xlu0 %980  ;;  %v1003_v25 = vadd.f32 %v383_v62, %v382_v0 }
 0x1ce   : > { %v2265_v35 = vrot.slane %v981_v29, %v3746_v54 }
 0x1cf   : > { %v4336_v36 = vsel %vm1778_vm5, %v2349_v51, %v4284_v19  ;;  %1094 = vadd.xlane.f32.xlu1 %v1093_v24  ;;  %v538_v19 = vld [vmem:[%s3563_s6 + $0xbb0] sm:$0xff] }
 0x1d0   : > { %v4340_v37 = vsel %vm1771_vm4, %v2265_v35, %v4204_v39  ;;  %1052 = vadd.xlane.f32.xlu0 %v1051_v3  ;;  %v1125_v40 = vpop.xlane.xlu1 %1124  ;;  %v1237_v61 = vadd.f32 %v539_v56, %v538_v19  ;;  %v663_v3 = vld [vmem:[%s3563_s6 + $0xf98] sm:$0xff]  ;;  %v445_v35 = vld [vmem:[%s3563_s6 + $0x8c8] sm:$0xff]  ;;  %v506_v19 = vld [vmem:[%s3563_s6 + $0xab0] sm:$0xff] }
 0x1d1   : > { %v2502_v28 = vrot.slane %v1125_v40, %v3746_v54  ;;  %v1074_v52 = vpop.xlane.xlu0 %1073  ;;  %v1096_v43 = vadd.f32 %v445_v35, %v444_v34  ;;  %v507_v56 = vld [vmem:[%s3563_s6 + $0xab8] sm:$0xff] }
 0x1d2   : > { %v2418_v57 = vrot.slane %v1074_v52, %v3749_v55  ;;  %v1189_v63 = vadd.f32 %v507_v56, %v506_v19 }
 0x1d3   : > { %v4350_v39 = vsel %vm1771_vm4, %v2502_v28, %v4296_v32  ;;  %1187 = vadd.xlane.f32.xlu1 %v1186_v30  ;;  %v600_v32 = vld [vmem:[%s3563_s6 + $0xda0] sm:$0xff] }
 0x1d4   : > { %v4354_v59 = vsel %vm1764_vm3, %v2418_v57, %v4281_v17  ;;  %1145 = vadd.xlane.f32.xlu0 %v1144_v41  ;;  %v1218_v60 = vpop.xlane.xlu1 %1217  ;;  %v1330_v18 = vadd.f32 %v601_v8, %v600_v32  ;;  %v417_v41 = vld [vmem:[%s3563_s6 + $0x7e8] sm:$0xff]  ;;  %v568_v32 = vld [vmem:[%s3563_s6 + $0xca0] sm:$0xff] }
 0x1d5   : > { %v2655_v4 = vrot.slane %v1218_v60, %v3749_v55  ;;  %v1167_v6 = vpop.xlane.xlu0 %1166  ;;  %v479_v60 = vld [vmem:[%s3563_s6 + $0x9d8] sm:$0xff]  ;;  %v569_v8 = vld [vmem:[%s3563_s6 + $0xca8] sm:$0xff] }
 0x1d6   : > { %v2571_v50 = vrot.slane %v1167_v6, %v3735_v45  ;;  %v1282_v0 = vadd.f32 %v569_v8, %v568_v32 }
 0x1d7   : > { %v4364_v17 = vsel %vm1764_vm3, %v2655_v4, %v4304_v49  ;;  %1280 = vadd.xlane.f32.xlu1 %v1279_v58  ;;  %v662_v49 = vld [vmem:[%s3563_s6 + $0xf90] sm:$0xff] }
 0x1d8   : > { %v4368_v12 = vsel %vm1757_vm2, %v2571_v50, %v4293_v31  ;;  %1238 = vadd.xlane.f32.xlu0 %v1237_v61  ;;  %v1311_v14 = vpop.xlane.xlu1 %1310  ;;  %v1423_v16 = vadd.f32 %v663_v3, %v662_v49  ;;  %v478_v58 = vld [vmem:[%s3563_s6 + $0x9d0] sm:$0xff]  ;;  %v631_v3 = vld [vmem:[%s3563_s6 + $0xe98] sm:$0xff] }
 0x1d9   : > { %v2808_v24 = vrot.slane %v1311_v14, %v3735_v45  ;;  %v1260_v22 = vpop.xlane.xlu0 %1259  ;;  %v1147_v6 = vadd.f32 %v479_v60, %v478_v58  ;;  %v541_v14 = vld [vmem:[%s3563_s6 + $0xbc8] sm:$0xff]  ;;  %v630_v49 = vld [vmem:[%s3563_s6 + $0xe90] sm:$0xff]  ;;  %v447_v60 = vld [vmem:[%s3563_s6 + $0x8d8] sm:$0xff] }
 0x1da   : > { %v2724_v26 = vrot.slane %v1260_v22, %v3741_v47  ;;  %v1375_v34 = vadd.f32 %v631_v3, %v630_v49  ;;  %v446_v58 = vld [vmem:[%s3563_s6 + $0x8d0] sm:$0xff] }
 0x1db   : > { %v4378_v31 = vsel %vm1757_vm2, %v2808_v24, %v4314_v38  ;;  %1373 = vadd.xlane.f32.xlu1 %v1372_v11  ;;  %v416_v38 = vld [vmem:[%s3563_s6 + $0x7e0] sm:$0xff]  ;;  %v1099_v32 = vadd.f32 %v447_v60, %v446_v58 }
 0x1dc   : > { %v4382_v51 = vsel %vm1750_vm1, %v2724_v26, %v4317_v5  ;;  %1331 = vadd.xlane.f32.xlu0 %v1330_v18  ;;  %v1353_v29 = vpop.xlane.xlu1 %1352  ;;  %v1054_v52 = vadd.f32 %v417_v41, %v416_v38  ;;  %v384_v38 = vld [vmem:[%s3563_s6 + $0x6e0] sm:$0xff]  ;;  %v385_v41 = vld [vmem:[%s3563_s6 + $0x6e8] sm:$0xff] }
 0x1dd   : > { %v2877_v30 = vrot.slane %v1353_v29, %v3738_v46  ;;  %v1350_v40 = vpop.xlane.xlu0 %1349  ;;  %v603_v29 = vld [vmem:[%s3563_s6 + $0xdb8] sm:$0xff]  ;;  %v1006_v19 = vadd.f32 %v385_v41, %v384_v38 }
 0x1de   : > { %v2873_v42 = vrot.slane %v1350_v40, %v3732_v44 }
 0x1df   : > { %1004 = vadd.xlane.f32.xlu1 %v1003_v25 }
 0x1e0   : > { %v4391_v5 = vsel %vm1743_vm0, %v2877_v30, %v2873_v42  ;;  %1424 = vadd.xlane.f32.xlu0 %v1423_v16  ;;  %v984_v28 = vpop.xlane.xlu1 %983  ;;  %vm3032_vm0 = vcmask 1043459  }
 0x1e1   : > { %v2270_v46 = vrot.slane %v984_v28, %v3773_v15  ;;  %v1404_v57 = vpop.xlane.xlu0 %1403  ;;  %v665_v28 = vld [vmem:[%s3563_s6 + $0xfa8] sm:$0xff] }
 0x1e2   : > { %v2961_v44 = vrot.slane %v1404_v57, %v3741_v47 }
 0x1e3   : > { %v4401_v61 = vsel %vm1778_vm5, %v2270_v46, %v4340_v37  ;;  %1097 = vadd.xlane.f32.xlu1 %v1096_v43  ;;  %v540_v37 = vld [vmem:[%s3563_s6 + $0xbc0] sm:$0xff] }
 0x1e4   : > { %v4405_v1 = vsel %vm1750_vm1, %v2961_v44, %v4326_v21  ;;  %1055 = vadd.xlane.f32.xlu0 %v1054_v52  ;;  %v1077_v4 = vpop.xlane.xlu1 %1076  ;;  %v1240_v22 = vadd.f32 %v541_v14, %v540_v37  ;;  %v509_v37 = vld [vmem:[%s3563_s6 + $0xac8] sm:$0xff] }
 0x1e5   : > { %v2423_v50 = vrot.slane %v1077_v4, %v3746_v54  ;;  %v1035_v11 = vpop.xlane.xlu0 %1034  ;;  %v419_v4 = vld [vmem:[%s3563_s6 + $0x7f8] sm:$0xff] }
 0x1e6   : > { %v2354_v18 = vrot.slane %v1035_v11, %v3765_v9  ;;  %v508_v11 = vld [vmem:[%s3563_s6 + $0xac0] sm:$0xff] }
 0x1e7   : > { %v4415_v21 = vsel %vm1771_vm4, %v2423_v50, %v4354_v59  ;;  %1190 = vadd.xlane.f32.xlu1 %v1189_v63  ;;  %v602_v59 = vld [vmem:[%s3563_s6 + $0xdb0] sm:$0xff] }
 0x1e8   : > { %v4419_v62 = vsel %vm1785_vm6, %v2354_v18, %v4336_v36  ;;  %1148 = vadd.xlane.f32.xlu0 %v1147_v6  ;;  %v1170_v24 = vpop.xlane.xlu1 %1169  ;;  %v1333_v40 = vadd.f32 %v603_v29, %v602_v59  ;;  %v571_v59 = vld [vmem:[%s3563_s6 + $0xcb8] sm:$0xff] }
 0x1e9   : > { %v2576_v26 = vrot.slane %v1170_v24, %v3749_v55  ;;  %v1128_v25 = vpop.xlane.xlu0 %1127 }
 0x1ea   : > { %v2507_v16 = vrot.slane %v1128_v25, %v3773_v15  ;;  %v570_v25 = vld [vmem:[%s3563_s6 + $0xcb0] sm:$0xff] }
 0x1eb   : > { %v4429_v36 = vsel %vm1764_vm3, %v2576_v26, %v4368_v12  ;;  %1283 = vadd.xlane.f32.xlu1 %v1282_v0  ;;  %v664_v12 = vld [vmem:[%s3563_s6 + $0xfa0] sm:$0xff]  ;;  %v481_v0 = vld [vmem:[%s3563_s6 + $0x9e8] sm:$0xff] }
 0x1ec   : > { %v4433_v35 = vsel %vm1778_vm5, %v2507_v16, %v4350_v39  ;;  %1241 = vadd.xlane.f32.xlu0 %v1240_v22  ;;  %v1263_v30 = vpop.xlane.xlu1 %1262  ;;  %v1426_v57 = vadd.f32 %v665_v28, %v664_v12  ;;  %v1192_v22 = vadd.f32 %v509_v37, %v508_v11  ;;  %v633_v12 = vld [vmem:[%s3563_s6 + $0xea8] sm:$0xff] }
 0x1ed   : > { %v2729_v42 = vrot.slane %v1263_v30, %v3735_v45  ;;  %v1221_v43 = vpop.xlane.xlu0 %1220 }
 0x1ee   : > { %v2660_v52 = vrot.slane %v1221_v43, %v3746_v54  ;;  %v632_v43 = vld [vmem:[%s3563_s6 + $0xea0] sm:$0xff] }
 0x1ef   : > { %v4443_v39 = vsel %vm1757_vm2, %v2729_v42, %v4382_v51  ;;  %1376 = vadd.xlane.f32.xlu1 %v1375_v34  ;;  %v418_v51 = vld [vmem:[%s3563_s6 + $0x7f0] sm:$0xff]  ;;  %v543_v34 = vld [vmem:[%s3563_s6 + $0xbd8] sm:$0xff] }
 0x1f0   : > { %v4447_v56 = vsel %vm1771_vm4, %v2660_v52, %v4364_v17  ;;  %1334 = vadd.xlane.f32.xlu0 %v1333_v40  ;;  %v1356_v46 = vpop.xlane.xlu1 %1355  ;;  %v1285_v40 = vadd.f32 %v571_v59, %v570_v25 }
 0x1f1   : > { %v2882_v44 = vrot.slane %v1356_v46, %v3741_v47  ;;  %v1314_v63 = vpop.xlane.xlu0 %1313  ;;  %v1057_v47 = vadd.f32 %v419_v4, %v418_v51  ;;  %v387_v51 = vld [vmem:[%s3563_s6 + $0x6f8] sm:$0xff] }
 0x1f2   : > { %v2813_v6 = vrot.slane %v1314_v63, %v3749_v55  ;;  %v386_v63 = vld [vmem:[%s3563_s6 + $0x6f0] sm:$0xff] }
 0x1f3   : > { %v4457_v17 = vsel %vm1750_vm1, %v2882_v44, %v4391_v5  ;;  %1007 = vadd.xlane.f32.xlu1 %v1006_v19  ;;  %v480_v5 = vld [vmem:[%s3563_s6 + $0x9e0] sm:$0xff]  ;;  %v605_v19 = vld [vmem:[%s3563_s6 + $0xdc8] sm:$0xff]  ;;  %vm3034_vm1 = vcmask 1044484  }
 0x1f4   : > { %v4461_v8 = vsel %vm1764_vm3, %v2813_v6, %v4378_v31  ;;  %1427 = vadd.xlane.f32.xlu0 %v1426_v57  ;;  %v987_v50 = vpop.xlane.xlu1 %986  ;;  %v1150_v26 = vadd.f32 %v481_v0, %v480_v5  ;;  %v1378_v57 = vadd.f32 %v633_v12, %v632_v43  ;;  %v483_v5 = vld [vmem:[%s3563_s6 + $0x9f8] sm:$0xff] }
 0x1f5   : > { %v2275_v14 = vrot.slane %v987_v50, %v3765_v9  ;;  %v1407_v18 = vpop.xlane.xlu0 %1406 }
 0x1f6   : > { %v2966_v24 = vrot.slane %v1407_v18, %v3735_v45  ;;  %v482_v18 = vld [vmem:[%s3563_s6 + $0x9f0] sm:$0xff] }
 0x1f7   : > { %v4471_v31 = vsel %vm1785_vm6, %v2275_v14, %v4401_v61  ;;  %1100 = vadd.xlane.f32.xlu1 %v1099_v32  ;;  %v542_v61 = vld [vmem:[%s3563_s6 + $0xbd0] sm:$0xff]  ;;  %v667_v32 = vld [vmem:[%s3563_s6 + $0xfb8] sm:$0xff] }
 0x1f8   : > { %v4475_v49 = vsel %vm1757_vm2, %v2966_v24, %v4405_v1  ;;  %1058 = vadd.xlane.f32.xlu0 %v1057_v47  ;;  %v1080_v3 = vpop.xlane.xlu1 %1079  ;;  %v1243_v42 = vadd.f32 %v543_v34, %v542_v61  ;;  %v1009_v47 = vadd.f32 %v387_v51, %v386_v63 }
 0x1f9   : > { %v2428_v29 = vrot.slane %v1080_v3, %v3773_v15  ;;  %v1038_v16 = vpop.xlane.xlu0 %1037 }
 0x1fa   : > { %v2359_v30 = vrot.slane %v1038_v16, %v3789_v33  ;;  %v545_v16 = vld [vmem:[%s3563_s6 + $0xbe8] sm:$0xff] }
 0x1fb   : > { %v4485_v1 = vsel %vm1778_vm5, %v2428_v29, %v4415_v21  ;;  %1193 = vadd.xlane.f32.xlu1 %v1192_v22  ;;  %v604_v21 = vld [vmem:[%s3563_s6 + $0xdc0] sm:$0xff]  ;;  %v449_v22 = vld [vmem:[%s3563_s6 + $0x8e8] sm:$0xff] }
 0x1fc   : > { %v4489_v38 = vsel %vm1792_vm7, %v2359_v30, %v4419_v62  ;;  %1151 = vadd.xlane.f32.xlu0 %v1150_v26  ;;  %v1173_v41 = vpop.xlane.xlu1 %1172  ;;  %v1336_v44 = vadd.f32 %v605_v19, %v604_v21  ;;  %v1153_v26 = vadd.f32 %v483_v5, %v482_v18  ;;  %v544_v29 = vld [vmem:[%s3563_s6 + $0xbe0] sm:$0xff]  ;;  %v511_v30 = vld [vmem:[%s3563_s6 + $0xad8] sm:$0xff] }
 0x1fd   : > { %v2581_v28 = vrot.slane %v1173_v41, %v3746_v54  ;;  %v1131_v52 = vpop.xlane.xlu0 %1130  ;;  %v1246_v41 = vadd.f32 %v545_v16, %v544_v29 }
 0x1fe   : > { %v2512_v46 = vrot.slane %v1131_v52, %v3765_v9  ;;  %v607_v52 = vld [vmem:[%s3563_s6 + $0xdd8] sm:$0xff] }
 0x1ff   : > { %v4499_v62 = vsel %vm1771_vm4, %v2581_v28, %v4429_v36  ;;  %1286 = vadd.xlane.f32.xlu1 %v1285_v40  ;;  %v666_v36 = vld [vmem:[%s3563_s6 + $0xfb0] sm:$0xff] }
 0x200   : > { %v4503_v58 = vsel %vm1785_vm6, %v2512_v46, %v4433_v35  ;;  %1244 = vadd.xlane.f32.xlu0 %v1243_v42  ;;  %v1266_v60 = vpop.xlane.xlu1 %1265  ;;  %v1429_v14 = vadd.f32 %v667_v32, %v666_v36  ;;  %v606_v28 = vld [vmem:[%s3563_s6 + $0xdd0] sm:$0xff]  ;;  %v573_v46 = vld [vmem:[%s3563_s6 + $0xcc8] sm:$0xff] }
 0x201   : > { %v2734_v4 = vrot.slane %v1266_v60, %v3749_v55  ;;  %v1224_v6 = vpop.xlane.xlu0 %1223  ;;  %v1339_v60 = vadd.f32 %v607_v52, %v606_v28  ;;  %v636_v52 = vld [vmem:[%s3563_s6 + $0xec0] sm:$0xff] }
 0x202   : > { %v2665_v50 = vrot.slane %v1224_v6, %v3773_v15  ;;  %v669_v6 = vld [vmem:[%s3563_s6 + $0xfc8] sm:$0xff] }
 0x203   : > { %v4513_v35 = vsel %vm1764_vm3, %v2734_v4, %v4443_v39  ;;  %1379 = vadd.xlane.f32.xlu1 %v1378_v57  ;;  %v448_v39 = vld [vmem:[%s3563_s6 + $0x8e0] sm:$0xff] }
 0x204   : > { %v4517_v11 = vsel %vm1778_vm5, %v2665_v50, %v4447_v56  ;;  %1337 = vadd.xlane.f32.xlu0 %v1336_v44  ;;  %v1359_v37 = vpop.xlane.xlu1 %1358  ;;  %v668_v4 = vld [vmem:[%s3563_s6 + $0xfc0] sm:$0xff]  ;;  %v635_v50 = vld [vmem:[%s3563_s6 + $0xeb8] sm:$0xff] }
 0x205   : > { %v2887_v0 = vrot.slane %v1359_v37, %v3735_v45  ;;  %v1317_v24 = vpop.xlane.xlu0 %1316  ;;  %v1102_v45 = vadd.f32 %v449_v22, %v448_v39  ;;  %v1432_v37 = vadd.f32 %v669_v6, %v668_v4  ;;  %v514_v6 = vld [vmem:[%s3563_s6 + $0xaf0] sm:$0xff] }
 0x206   : > { %v2818_v3 = vrot.slane %v1317_v24, %v3746_v54  ;;  %v513_v24 = vld [vmem:[%s3563_s6 + $0xae8] sm:$0xff] }
 0x207   : > { %v4527_v56 = vsel %vm1757_vm2, %v2887_v0, %v4457_v17  ;;  %1010 = vadd.xlane.f32.xlu1 %v1009_v47  ;;  %v510_v17 = vld [vmem:[%s3563_s6 + $0xad0] sm:$0xff]  ;;  %v512_v0 = vld [vmem:[%s3563_s6 + $0xae0] sm:$0xff]  ;;  %vm3036_vm2 = vcmask 1045509  }
 0x208   : > { %v4531_v25 = vsel %vm1771_vm4, %v2818_v3, %v4461_v8  ;;  %1430 = vadd.xlane.f32.xlu0 %v1429_v14  ;;  %v990_v59 = vpop.xlane.xlu1 %989  ;;  %v1195_v12 = vadd.f32 %v511_v30, %v510_v17  ;;  %v451_v3 = vld [vmem:[%s3563_s6 + $0x8f8] sm:$0xff] }
 0x209   : > { %v2280_v61 = vrot.slane %v990_v59, %v3789_v33  ;;  %v1410_v34 = vpop.xlane.xlu0 %1409  ;;  %v1198_v59 = vadd.f32 %v513_v24, %v512_v0  ;;  %v610_v24 = vld [vmem:[%s3563_s6 + $0xdf0] sm:$0xff] }
 0x20a   : > { %v2971_v40 = vrot.slane %v1410_v34, %v3749_v55  ;;  %v575_v34 = vld [vmem:[%s3563_s6 + $0xcd8] sm:$0xff] }
 0x20b   : > { %v4541_v8 = vsel %vm1792_vm7, %v2280_v61, %v4471_v31  ;;  %1154 = vadd.xlane.f32.xlu1 %v1153_v26  ;;  %v572_v31 = vld [vmem:[%s3563_s6 + $0xcc0] sm:$0xff]  ;;  %v574_v61 = vld [vmem:[%s3563_s6 + $0xcd0] sm:$0xff] }
 0x20c   : > { %v4545_v42 = vsel %vm1764_vm3, %v2971_v40, %v4475_v49  ;;  %1103 = vadd.xlane.f32.xlu0 %v1102_v45  ;;  %v1083_v43 = vpop.xlane.xlu1 %1082  ;;  %v1288_v51 = vadd.f32 %v573_v46, %v572_v31  ;;  %v547_v40 = vld [vmem:[%s3563_s6 + $0xbf8] sm:$0xff]  ;;  %v609_v46 = vld [vmem:[%s3563_s6 + $0xde8] sm:$0xff] }
 0x20d   : > { %v2433_v21 = vrot.slane %v1083_v43, %v3765_v9  ;;  %v1041_v19 = vpop.xlane.xlu0 %1040  ;;  %v1291_v43 = vadd.f32 %v575_v34, %v574_v61 }
 0x20e   : > { %v2364_v57 = vrot.slane %v1041_v19, %v3782_v27 }
 0x20f   : > { %v4555_v49 = vsel %vm1785_vm6, %v2433_v21, %v4485_v1  ;;  %1247 = vadd.xlane.f32.xlu1 %v1246_v41  ;;  %v634_v1 = vld [vmem:[%s3563_s6 + $0xeb0] sm:$0xff]  ;;  %v637_v21 = vld [vmem:[%s3563_s6 + $0xec8] sm:$0xff] }
 0x210   : > { %v4559_v44 = vsel %vm1799_vm8, %v2364_v57, %v4489_v38  ;;  %1196 = vadd.xlane.f32.xlu0 %v1195_v12  ;;  %v1176_v63 = vpop.xlane.xlu1 %1175  ;;  %v1381_v5 = vadd.f32 %v635_v50, %v634_v1  ;;  %v671_v50 = vld [vmem:[%s3563_s6 + $0xfd8] sm:$0xff] }
 0x211   : > { %v2586_v36 = vrot.slane %v1176_v63, %v3773_v15  ;;  %v1134_v32 = vpop.xlane.xlu0 %1133 }
 0x212   : > { %v2517_v47 = vrot.slane %v1134_v32, %v3789_v33 }
 0x213   : > { %v4569_v38 = vsel %vm1778_vm5, %v2586_v36, %v4499_v62  ;;  %1340 = vadd.xlane.f32.xlu1 %v1339_v60  ;;  %v450_v62 = vld [vmem:[%s3563_s6 + $0x8f0] sm:$0xff]  ;;  %v1384_v60 = vadd.f32 %v637_v21, %v636_v52  ;;  %v515_v36 = vld [vmem:[%s3563_s6 + $0xaf8] sm:$0xff] }
 0x214   : > { %v4573_v14 = vsel %vm1792_vm7, %v2517_v47, %v4503_v58  ;;  %1289 = vadd.xlane.f32.xlu0 %v1288_v51  ;;  %v1269_v18 = vpop.xlane.xlu1 %1268  ;;  %v1105_v16 = vadd.f32 %v451_v3, %v450_v62  ;;  %v576_v3 = vld [vmem:[%s3563_s6 + $0xce0] sm:$0xff] }
 0x215   : > { %v2739_v39 = vrot.slane %v1269_v18, %v3746_v54  ;;  %v1227_v22 = vpop.xlane.xlu0 %1226 }
 0x216   : > { %v2670_v26 = vrot.slane %v1227_v22, %v3765_v9 }
 0x217   : > { %v4583_v58 = vsel %vm1771_vm4, %v2739_v39, %v4513_v35  ;;  %1433 = vadd.xlane.f32.xlu1 %v1432_v37  ;;  %v546_v35 = vld [vmem:[%s3563_s6 + $0xbf0] sm:$0xff]  ;;  %v1201_v37 = vadd.f32 %v515_v36, %v514_v6  ;;  %v611_v39 = vld [vmem:[%s3563_s6 + $0xdf8] sm:$0xff] }
 0x218   : > { %v4587_v45 = vsel %vm1785_vm6, %v2670_v26, %v4517_v11  ;;  %1382 = vadd.xlane.f32.xlu0 %v1381_v5  ;;  %v1362_v29 = vpop.xlane.xlu1 %1361  ;;  %v1463_v6 = vld [vmem:[%s5043_s1 + $0x98] sm:$0xff] }
 0x219   : > { %v2892_v17 = vrot.slane %v1362_v29, %v3749_v55  ;;  %v1320_v30 = vpop.xlane.xlu0 %1319  ;;  %v1249_v55 = vadd.f32 %v547_v40, %v546_v35  ;;  %v672_v29 = vld [vmem:[%s3563_s6 + $0xfe0] sm:$0xff] }
 0x21a   : > { %v2823_v41 = vrot.slane %v1320_v30, %v3773_v15  ;;  %v638_v30 = vld [vmem:[%s3563_s6 + $0xed0] sm:$0xff]  ;;  %v1460_v35 = vld [vmem:[%s5043_s1 + $0x80] sm:$0xff] }
 0x21b   : > { %v4597_v11 = vsel %vm1764_vm3, %v2892_v17, %v4527_v56  ;;  %1199 = vadd.xlane.f32.xlu1 %v1198_v59  ;;  %v608_v56 = vld [vmem:[%s3563_s6 + $0xde0] sm:$0xff]  ;;  %vm3038_vm3 = vcmask 1046534  }
 0x21c   : > { %v4601_v12 = vsel %vm1778_vm5, %v2823_v41, %v4531_v25  ;;  %1106 = vadd.xlane.f32.xlu0 %v1105_v16  ;;  %v993_v28 = vpop.xlane.xlu1 %992  ;;  %v1342_v4 = vadd.f32 %v609_v46, %v608_v56  ;;  %v673_v16 = vld [vmem:[%s3563_s6 + $0xfe8] sm:$0xff]  ;;  %v640_v56 = vld [vmem:[%s3563_s6 + $0xee0] sm:$0xff] }
 0x21d   : > { %v2285_v19 = vrot.slane %v993_v28, %v3782_v27  ;;  %v1413_v31 = vpop.xlane.xlu0 %1412  ;;  %v1444_v28 = vld [vmem:[%s5043_s1] sm:$0xff]  ;;  %v641_v46 = vld [vmem:[%s3563_s6 + $0xee8] sm:$0xff] }
 0x21e   : > { %v2976_v57 = vrot.slane %v1413_v31, %v3746_v54  ;;  %v1438_v31 = vadd.f32 %v673_v16, %v672_v29  ;;  %v675_v29 = vld [vmem:[%s3563_s6 + $0xff8] sm:$0xff] }
 0x21f   : > { %v4611_v25 = vsel %vm1799_vm8, %v2285_v19, %v4541_v8  ;;  %1292 = vadd.xlane.f32.xlu1 %v1291_v43  ;;  %v670_v8 = vld [vmem:[%s3563_s6 + $0xfd0] sm:$0xff]  ;;  %v639_v43 = vld [vmem:[%s3563_s6 + $0xed8] sm:$0xff] }
 0x220   : > { %v4615_v63 = vsel %vm1771_vm4, %v2976_v57, %v4545_v42  ;;  %1250 = vadd.xlane.f32.xlu0 %v1249_v55  ;;  %v1086_v51 = vpop.xlane.xlu1 %1085  ;;  %v1435_v0 = vadd.f32 %v671_v50, %v670_v8  ;;  %v1445_v55 = vld [vmem:[%s5043_s1 + $0x8] sm:$0xff]  ;;  %v1446_v8 = vld [vmem:[%s5043_s1 + $0x10] sm:$0xff]  ;;  %v1447_v50 = vld [vmem:[%s5043_s1 + $0x18] sm:$0xff] }
 0x221   : > { %v2438_v32 = vrot.slane %v1086_v51, %v3789_v33  ;;  %v1044_v1 = vpop.xlane.xlu0 %1043  ;;  %v3260_v21 = vpack.c.bf16 %v1445_v55, %v1444_v28  ;;  %v1387_v51 = vadd.f32 %v639_v43, %v638_v30 }
 0x222   : > { %v2369_v47 = vrot.slane %v1044_v1, %v3805_v53 }
 0x223   : > { %v4625_v42 = vsel %vm1792_vm7, %v2438_v32, %v4555_v49  ;;  %1385 = vadd.xlane.f32.xlu1 %v1384_v60  ;;  %v577_v49 = vld [vmem:[%s3563_s6 + $0xce8] sm:$0xff] }
 0x224   : > { %v4629_v18 = vsel %vm1806_vm9, %v2369_v47, %v4559_v44  ;;  %1343 = vadd.xlane.f32.xlu0 %v1342_v4  ;;  %v1179_v5 = vpop.xlane.xlu1 %1178  ;;  %v1345_v44 = vadd.f32 %v611_v39, %v610_v24  ;;  %v1294_v17 = vadd.f32 %v577_v49, %v576_v3  ;;  %v578_v4 = vld [vmem:[%s3563_s6 + $0xcf0] sm:$0xff]  ;;  %v643_v24 = vld [vmem:[%s3563_s6 + $0xef8] sm:$0xff]  ;;  %v1465_v49 = vld [vmem:[%s5043_s1 + $0xa8] sm:$0xff] }
 0x225   : > { %v2591_v22 = vrot.slane %v1179_v5, %v3765_v9  ;;  %v1137_v62 = vpop.xlane.xlu0 %1136  ;;  %v674_v3 = vld [vmem:[%s3563_s6 + $0xff0] sm:$0xff] }
 0x226   : > { %v2522_v26 = vrot.slane %v1137_v62, %v3782_v27  ;;  %v1441_v43 = vadd.f32 %v675_v29, %v674_v3  ;;  %v1473_v29 = vld [vmem:[%s5043_s1 + $0xe8] sm:$0xff] }
 0x227   : > { %v4639_v59 = vsel %vm1785_vm6, %v2591_v22, %v4569_v38  ;;  %1202 = vadd.xlane.f32.xlu1 %v1201_v37  ;;  %v1461_v38 = vld [vmem:[%s5043_s1 + $0x88] sm:$0xff]  ;;  %v3264_v37 = vpack.c.bf16 %v1447_v50, %v1446_v8 }
 0x228   : > { %v4645_v61 = vsel %vm1799_vm8, %v2522_v26, %v4573_v14  ;;  %1436 = vadd.xlane.f32.xlu0 %v1435_v0  ;;  %v1272_v34 = vpop.xlane.xlu1 %1271  ;;  %v3258_v14 = vpack.c.bf16 %v1461_v38, %v1460_v35  ;;  %v642_v0 = vld [vmem:[%s3563_s6 + $0xef0] sm:$0xff] }
 0x229   : > { %v2744_v40 = vrot.slane %v1272_v34, %v3773_v15  ;;  %v1230_v41 = vpop.xlane.xlu0 %1229  ;;  %v1449_v34 = vld [vmem:[%s5043_s1 + $0x28] sm:$0xff]  ;;  %v1393_v38 = vadd.f32 %v643_v24, %v642_v0 }
 0x22a   : > { %v2675_v52 = vrot.slane %v1230_v41, %v3789_v33  ;;  %3259 = vmatprep.subr.bf16.mxu0 %v3258_v14  ;;  %v1466_v14 = vld [vmem:[%s5043_s1 + $0xb0] sm:$0xff] }
 0x22b   : > { %v4665_v19 = vsel %vm1778_vm5, %v2744_v40, %v4583_v58  ;;  %1346 = vadd.xlane.f32.xlu1 %v1345_v44  ;;  %3261 = vmatpush3.bf16.msra.mxu0 %v3260_v21  ;;  %v1462_v58 = vld [vmem:[%s5043_s1 + $0x90] sm:$0xff]  ;;  %v1451_v21 = vld [vmem:[%s5043_s1 + $0x38] sm:$0xff] }
 0x22c   : > { %v4671_v57 = vsel %vm1792_vm7, %v2675_v52, %v4587_v45  ;;  %1295 = vadd.xlane.f32.xlu0 %v1294_v17  ;;  %v1365_v60 = vpop.xlane.xlu1 %1364  ;;  %v579_v45 = vld [vmem:[%s3563_s6 + $0xcf8] sm:$0xff]  ;;  %v3262_v1 = vpack.c.bf16 %v1463_v6, %v1462_v58  ;;  %v1469_v58 = vld [vmem:[%s5043_s1 + $0xc8] sm:$0xff] }
 0x22d   : > { %v2897_v36 = vrot.slane %v1365_v60, %v3746_v54  ;;  %v1323_v32 = vpop.xlane.xlu0 %1322  ;;  %v1390_v54 = vadd.f32 %v641_v46, %v640_v56  ;;  %v1297_v62 = vadd.f32 %v579_v45, %v578_v4  ;;  %v1468_v4 = vld [vmem:[%s5043_s1 + $0xc0] sm:$0xff] }
 0x22e   : > { %v2828_v47 = vrot.slane %v1323_v32, %v3765_v9  ;;  %3263 = vmatprep.subr.bf16.mxu0 %v3262_v1  ;;  %v1453_v32 = vld [vmem:[%s5043_s1 + $0x48] sm:$0xff] }
 0x22f   : > { %v4691_v5 = vsel %vm1771_vm4, %v2897_v36, %v4597_v11  ;;  %1439 = vadd.xlane.f32.xlu1 %v1438_v31  ;;  %3265 = vmatpush3.bf16.msra.mxu0 %v3264_v37  ;;  %v1464_v11 = vld [vmem:[%s5043_s1 + $0xa0] sm:$0xff]  ;;  %v3274_v36 = vpack.c.bf16 %v1469_v58, %v1468_v4  ;;  %v1470_v37 = vld [vmem:[%s5043_s1 + $0xd0] sm:$0xff]  ;;  %vm3040_vm4 = vcmask 1047559  }
 0x230   : > { %v4697_v39 = vsel %vm1785_vm6, %v2828_v47, %v4601_v12  ;;  %1388 = vadd.xlane.f32.xlu0 %v1387_v51  ;;  %v996_v22 = vpop.xlane.xlu1 %995  ;;  %v3266_v16 = vpack.c.bf16 %v1465_v49, %v1464_v11  ;;  %v1448_v12 = vld [vmem:[%s5043_s1 + $0x20] sm:$0xff] }
 0x231   : > { %v2290_v26 = vrot.slane %v996_v22, %v3805_v53  ;;  %v1416_v44 = vpop.xlane.xlu0 %1415  ;;  %v3268_v30 = vpack.c.bf16 %v1449_v34, %v1448_v12 }
 0x232   : > { %v2981_v17 = vrot.slane %v1416_v44, %v3773_v15  ;;  %3267 = vmatprep.subr.bf16.mxu0 %v3266_v16  ;;  %v1472_v44 = vld [vmem:[%s5043_s1 + $0xe0] sm:$0xff] }
 0x233   : > { %v4717_v35 = vsel %vm1806_vm9, %v2290_v26, %v4611_v25  ;;  %1391 = vadd.xlane.f32.xlu1 %v1390_v54  ;;  %3269 = vmatpush3.bf16.msra.mxu0 %v3268_v30  ;;  %v1467_v25 = vld [vmem:[%s5043_s1 + $0xb8] sm:$0xff]  ;;  %v3282_v34 = vpack.c.bf16 %v1473_v29, %v1472_v44 }
 0x234   : > { %v4721_v40 = vsel %vm1778_vm5, %v2981_v17, %v4615_v63  ;;  %1298 = vadd.xlane.f32.xlu0 %v1297_v62  ;;  %v1089_v41 = vpop.xlane.xlu1 %1088  ;;  %v3270_v52 = vpack.c.bf16 %v1467_v25, %v1466_v14  ;;  %v1450_v63 = vld [vmem:[%s5043_s1 + $0x30] sm:$0xff]  ;;  %v1471_v54 = vld [vmem:[%s5043_s1 + $0xd8] sm:$0xff] }
 0x235   : > { %v2443_v28 = vrot.slane %v1089_v41, %v3782_v27  ;;  %v1047_v55 = vpop.xlane.xlu0 %1046  ;;  %v3272_v56 = vpack.c.bf16 %v1451_v21, %v1450_v63  ;;  %v3278_v22 = vpack.c.bf16 %v1471_v54, %v1470_v37  ;;  %v1475_v14 = vld [vmem:[%s5043_s1 + $0xf8] sm:$0xff] }
 0x236   : > { %v2374_v31 = vrot.slane %v1047_v55, %v3798_v48  ;;  %3271 = vmatprep.subr.bf16.mxu0 %v3270_v52 }
 0x237   : > { %v4739_v46 = vsel %vm1799_vm8, %v2443_v28, %v4625_v42  ;;  %1394 = vadd.xlane.f32.xlu1 %v1393_v38  ;;  %3273 = vmatpush3.bf16.msra.mxu0 %v3272_v56 }
 0x238   : > { %v4743_v60 = vsel %vm1813_vm10, %v2374_v31, %v4629_v18  ;;  %1442 = vadd.xlane.f32.xlu0 %v1441_v43  ;;  %v1182_v51 = vpop.xlane.xlu1 %1181  ;;  %v1452_v18 = vld [vmem:[%s5043_s1 + $0x40] sm:$0xff]  ;;  %3275 = vmatprep.subr.bf16.mxu0 %v3274_v36  ;;  %v1474_v43 = vld [vmem:[%s5043_s1 + $0xf0] sm:$0xff] }
 0x239   : > { %v2596_v42 = vrot.slane %v1182_v51, %v3789_v33  ;;  %v1140_v6 = vpop.xlane.xlu0 %1139  ;;  %v3276_v1 = vpack.c.bf16 %v1453_v32, %v1452_v18  ;;  %v3286_v55 = vpack.c.bf16 %v1475_v14, %v1474_v43 }
 0x23a   : > { %v2527_v45 = vrot.slane %v1140_v6, %v3805_v53 }
 0x23b   : > { %v2597_v8 = vsel %vm1792_vm7, %v2596_v42, %v4639_v59  ;;  %3277 = vmatpush3.bf16.msra.mxu0 %v3276_v1  ;;  %v1454_v59 = vld [vmem:[%s5043_s1 + $0x50] sm:$0xff] }
 0x23c   : > { %v2528_v50 = vsel %vm1806_vm9, %v2527_v45, %v4645_v61  ;;  %v1275_v47 = vpop.xlane.xlu1 %1274  ;;  %v1455_v61 = vld [vmem:[%s5043_s1 + $0x58] sm:$0xff]  ;;  %3279 = vmatprep.subr.bf16.mxu0 %v3278_v22 }
 0x23d   : > { %v2749_v0 = vrot.slane %v1275_v47, %v3765_v9  ;;  %v1233_v24 = vpop.xlane.xlu0 %1232  ;;  %v3280_v3 = vpack.c.bf16 %v1455_v61, %v1454_v59 }
 0x23e   : > { %v2680_v62 = vrot.slane %v1233_v24, %v3782_v27 }
 0x23f   : > { %v2750_v11 = vsel %vm1785_vm6, %v2749_v0, %v4665_v19  ;;  %3281 = vmatpush3.bf16.msra.mxu0 %v3280_v3  ;;  %v1456_v19 = vld [vmem:[%s5043_s1 + $0x60] sm:$0xff] }
 0x240   : > { %v2681_v49 = vsel %vm1799_vm8, %v2680_v62, %v4671_v57  ;;  %v1368_v26 = vpop.xlane.xlu1 %1367  ;;  %v1457_v57 = vld [vmem:[%s5043_s1 + $0x68] sm:$0xff]  ;;  %3283 = vmatprep.subr.bf16.mxu0 %v3282_v34 }
 0x241   : > { %v2902_v16 = vrot.slane %v1368_v26, %v3773_v15  ;;  %v1326_v12 = vpop.xlane.xlu0 %1325  ;;  %v3284_v30 = vpack.c.bf16 %v1457_v57, %v1456_v19 }
 0x242   : > { %v2833_v17 = vrot.slane %v1326_v12, %v3789_v33 }
 0x243   : > { %v2903_v38 = vsel %vm1778_vm5, %v2902_v16, %v4691_v5  ;;  %3285 = vmatpush3.bf16.msra.mxu0 %v3284_v30  ;;  %v1458_v5 = vld [vmem:[%s5043_s1 + $0x70] sm:$0xff]  ;;  %vm3121_vm5 = vcmask 162816  }
 0x244   : > { %v2834_v15 = vsel %vm1792_vm7, %v2833_v17, %v4697_v39  ;;  %v999_v41 = vpop.xlane.xlu1 %998  ;;  %v1459_v39 = vld [vmem:[%s5043_s1 + $0x78] sm:$0xff]  ;;  %3287 = vmatprep.subr.bf16.mxu0 %v3286_v55 }
 0x245   : > { %v2295_v25 = vrot.slane %v999_v41, %v3798_v48  ;;  %v1419_v28 = vpop.xlane.xlu0 %1418  ;;  %v3288_v63 = vpack.c.bf16 %v1459_v39, %v1458_v5 }
 0x246   : > { %v2986_v52 = vrot.slane %v1419_v28, %v3765_v9 }
 0x247   : > { %v2296_v21 = vsel %vm1813_vm10, %v2295_v25, %v4717_v35  ;;  %3289 = vmatpush3.bf16.msra.mxu0 %v3288_v63 }
 0x248   : > { %v2987_v31 = vsel %vm1785_vm6, %v2986_v52, %v4721_v40  ;;  %v1092_v56 = vpop.xlane.xlu1 %1091 }
 0x249   : > { %v2448_v51 = vrot.slane %v1092_v56, %v3805_v53  ;;  %v1050_v4 = vpop.xlane.xlu0 %1049 }
 0x24a   : > { %v2379_v58 = vrot.slane %v1050_v4, %v3821_v7 }
 0x24b   : > { %v2449_v42 = vsel %vm1806_vm9, %v2448_v51, %v4739_v46 }
 0x24c   : > { %v2380_v6 = vsel %vm1820_vm11, %v2379_v58, %v4743_v60  ;;  %v1185_v36 = vpop.xlane.xlu1 %1184 }
 0x24d   : > { %v2601_v35 = vrot.slane %v1185_v36, %v3782_v27  ;;  %v1143_v18 = vpop.xlane.xlu0 %1142 }
 0x24e   : > { %v2532_v32 = vrot.slane %v1143_v18, %v3798_v48 }
 0x24f   : > { %v2602_v40 = vsel %vm1799_vm8, %v2601_v35, %v2597_v8 }
 0x250   : > { %v2533_v45 = vsel %vm1813_vm10, %v2532_v32, %v2528_v50  ;;  %v1278_v1 = vpop.xlane.xlu1 %1277 }
 0x251   : > { %v2754_v47 = vrot.slane %v1278_v1, %v3789_v33  ;;  %v1236_v37 = vpop.xlane.xlu0 %1235 }
 0x252   : > { %v2685_v54 = vrot.slane %v1236_v37, %v3805_v53 }
 0x253   : > { %v2755_v46 = vsel %vm1792_vm7, %v2754_v47, %v2750_v11 }
 0x254   : > { %v2686_v60 = vsel %vm1806_vm9, %v2685_v54, %v2681_v49  ;;  %v1371_v0 = vpop.xlane.xlu1 %1370 }
 0x255   : > { %v2907_v24 = vrot.slane %v1371_v0, %v3765_v9  ;;  %v1329_v22 = vpop.xlane.xlu0 %1328 }
 0x256   : > { %v2838_v59 = vrot.slane %v1329_v22, %v3782_v27 }
 0x257   : > { %v2908_v8 = vsel %vm1785_vm6, %v2907_v24, %v2903_v38 }
 0x258   : > { %v2839_v50 = vsel %vm1799_vm8, %v2838_v59, %v2834_v15  ;;  %v1002_v61 = vpop.xlane.xlu1 %1001 }
 0x259   : > { %v2300_v62 = vrot.slane %v1002_v61, %v3821_v7  ;;  %v1422_v3 = vpop.xlane.xlu0 %1421 }
 0x25a   : > { %v2991_v26 = vrot.slane %v1422_v3, %v3789_v33 }
 0x25b   : > { %v2301_v11 = vsel %vm1820_vm11, %v2300_v62, %v2296_v21 }
 0x25c   : > { %v2992_v49 = vsel %vm1792_vm7, %v2991_v26, %v2987_v31  ;;  %v1095_v44 = vpop.xlane.xlu1 %1094 }
 0x25d   : > { %v2453_v9 = vrot.slane %v1095_v44, %v3798_v48  ;;  %v1053_v29 = vpop.xlane.xlu0 %1052 }
 0x25e   : > { %v2384_v16 = vrot.slane %v1053_v29, %v3814_v2 }
 0x25f   : > { %v2454_v12 = vsel %vm1813_vm10, %v2453_v9, %v2449_v42 }
 0x260   : > { %v2385_v34 = vsel %vm1827_vm12, %v2384_v16, %v2380_v6  ;;  %v1188_v19 = vpop.xlane.xlu1 %1187 }
 0x261   : > { %v2606_v57 = vrot.slane %v1188_v19, %v3805_v53  ;;  %v1146_v17 = vpop.xlane.xlu0 %1145 }
 0x262   : > { %v2537_v30 = vrot.slane %v1146_v17, %v3821_v7 }
 0x263   : > { %v2607_v38 = vsel %vm1806_vm9, %v2606_v57, %v2602_v40 }
 0x264   : > { %v2538_v15 = vsel %vm1820_vm11, %v2537_v30, %v2533_v45  ;;  %v1281_v41 = vpop.xlane.xlu1 %1280 }
 0x265   : > { %v2759_v43 = vrot.slane %v1281_v41, %v3782_v27  ;;  %v1239_v14 = vpop.xlane.xlu0 %1238 }
 0x266   : > { %v2690_v25 = vrot.slane %v1239_v14, %v3798_v48 }
 0x267   : > { %v2760_v28 = vsel %vm1799_vm8, %v2759_v43, %v2755_v46 }
 0x268   : > { %v2691_v55 = vsel %vm1813_vm10, %v2690_v25, %v2686_v60  ;;  %v1374_v5 = vpop.xlane.xlu1 %1373 }
 0x269   : > { %v2912_v39 = vrot.slane %v1374_v5, %v3789_v33  ;;  %v1332_v52 = vpop.xlane.xlu0 %1331 }
 0x26a   : > { %v2843_v63 = vrot.slane %v1332_v52, %v3805_v53 }
 0x26b   : > { %v2913_v21 = vsel %vm1792_vm7, %v2912_v39, %v2908_v8 }
 0x26c   : > { %v2844_v31 = vsel %vm1806_vm9, %v2843_v63, %v2839_v50  ;;  %v1005_v56 = vpop.xlane.xlu1 %1004 }
 0x26d   : > { %v2305_v51 = vrot.slane %v1005_v56, %v3814_v2  ;;  %v1425_v4 = vpop.xlane.xlu0 %1424 }
 0x26e   : > { %v2996_v58 = vrot.slane %v1425_v4, %v3782_v27 }
 0x26f   : > { %v2306_v42 = vsel %vm1827_vm12, %v2305_v51, %v2301_v11 }
 0x270   : > { %v4859_v6 = vsel %vm1799_vm8, %v2996_v58, %v2992_v49  ;;  %v1098_v36 = vpop.xlane.xlu1 %1097 }
 0x271   : > { %v2458_v33 = vrot.slane %v1098_v36, %v3821_v7  ;;  %v1056_v35 = vpop.xlane.xlu0 %1055 }
 0x272   : > { %v2389_v18 = vrot.slane %v1056_v35, %v3836_v23 }
 0x273   : > { %v2459_v32 = vsel %vm1820_vm11, %v2458_v33, %v2454_v12 }
 0x274   : > { %v2390_v40 = vsel %vm1834_vm13, %v2389_v18, %v2385_v34  ;;  %v1191_v45 = vpop.xlane.xlu1 %1190 }
 0x275   : > { %v2611_v1 = vrot.slane %v1191_v45, %v3798_v48  ;;  %v1149_v47 = vpop.xlane.xlu0 %1148 }
 0x276   : > { %v2542_v37 = vrot.slane %v1149_v47, %v3814_v2 }
 0x277   : > { %v4868_v54 = vsel %vm1813_vm10, %v2611_v1, %v2607_v38 }
 0x278   : > { %v2543_v46 = vsel %vm1827_vm12, %v2542_v37, %v2538_v15  ;;  %v1284_v60 = vpop.xlane.xlu1 %1283 }
 0x279   : > { %v2764_v0 = vrot.slane %v1284_v60, %v3805_v53  ;;  %v1242_v24 = vpop.xlane.xlu0 %1241 }
 0x27a   : > { %v2695_v22 = vrot.slane %v1242_v24, %v3821_v7 }
 0x27b   : > { %v4874_v59 = vsel %vm1806_vm9, %v2764_v0, %v2760_v28 }
 0x27c   : > { %v2696_v8 = vsel %vm1820_vm11, %v2695_v22, %v2691_v55  ;;  %v1377_v50 = vpop.xlane.xlu1 %1376 }
 0x27d   : > { %v2917_v61 = vrot.slane %v1377_v50, %v3782_v27  ;;  %v1335_v62 = vpop.xlane.xlu0 %1334 }
 0x27e   : > { %v2848_v3 = vrot.slane %v1335_v62, %v3798_v48 }
 0x27f   : > { %v4880_v26 = vsel %vm1799_vm8, %v2917_v61, %v2913_v21 }
 0x280   : > { %v4883_v11 = vsel %vm1813_vm10, %v2848_v3, %v2844_v31  ;;  %v1008_v49 = vpop.xlane.xlu1 %1007 }
 0x281   : > { %v4885_v44 = vpop.xlane.xlu0 %1427  ;;  %v2310_v15 = vrot.slane %v1008_v49, %v3836_v23 }
 0x283   : > { %v2311_v25 = vsel %vm1834_vm13, %v2310_v15, %v2306_v42 }
 0x284   : > { %v1101_v9 = vpop.xlane.xlu1 %1100 }
 0x285   : > { %v1059_v29 = vpop.xlane.xlu0 %1058 }
 0x286   : > { %v2394_v16 = vrot.slane %v1059_v29, %v3830_v20 }
 0x288   : > { %v2395_v12 = vsel %vm1841_vm14, %v2394_v16, %v2390_v40  ;;  %v1194_v27 = vpop.xlane.xlu1 %1193 }
 0x289   : > { %v3044_v34 = vsel %vm3032_vm0, %v2395_v12, %v4187_v13  ;;  %v1152_v19 = vpop.xlane.xlu0 %1151  ;;  %v2616_v61 = vrot.slane %v1194_v27, %v3821_v7 }
 0x28a   : > { %v2547_v28 = vrot.slane %v1152_v19, %v3836_v23 }
 0x28c   : > { %v4891_v57 = vpop.xlane.xlu1 %1286  ;;  %v2548_v63 = vsel %vm1834_vm13, %v2547_v28, %v2543_v46 }
 0x28d   : > { %v1245_v17 = vpop.xlane.xlu0 %1244 }
 0x28e   : > { %v2700_v45 = vrot.slane %v1245_v17, %v3814_v2 }
 0x290   : > { %v4893_v30 = vpop.xlane.xlu1 %1379  ;;  %v2701_v22 = vsel %vm1827_vm12, %v2700_v45, %v2696_v8  ;;  %v2617_v8 = vsel %vm1820_vm11, %v2616_v61, %v4868_v54 }
 0x291   : > { %v1338_v38 = vpop.xlane.xlu0 %1337 }
 0x292   : > { %v2853_v12 = vrot.slane %v1338_v38, %v3821_v7 }
 0x294   : > { %v1011_v41 = vpop.xlane.xlu1 %1010  ;;  %v2854_v28 = vsel %vm1820_vm11, %v2853_v12, %v4883_v11  ;;  %v2922_v11 = vrot.slane %v4893_v30, %v3805_v53 }
 0x295   : > { %v2315_v43 = vrot.slane %v1011_v41, %v3830_v20  ;;  %v4897_v14 = vpop.xlane.xlu0 %1430 }
 0x296   : > { %v3006_v30 = vrot.slane %v4897_v14, %v3798_v48 }
 0x297   : > { %v2316_v13 = vsel %vm1841_vm14, %v2315_v43, %v2311_v25 }
 0x298   : > { %v3033_v55 = vsel %vm3032_vm0, %v2316_v13, %v4120_v10  ;;  %v1155_v5 = vpop.xlane.xlu1 %1154  ;;  %v2463_v10 = vrot.slane %v1101_v9, %v3814_v2 }
 0x299   : > { %v2552_v39 = vrot.slane %v1155_v5, %v3830_v20  ;;  %v1104_v52 = vpop.xlane.xlu0 %1103 }
 0x29a   : > { %v2468_v33 = vrot.slane %v1104_v52, %v3836_v23  ;;  %v2464_v40 = vsel %vm1827_vm12, %v2463_v10, %v2459_v32  ;;  %v3001_v10 = vrot.slane %v4885_v44, %v3805_v53 }
 0x29b   : > { %v2553_v21 = vsel %vm1841_vm14, %v2552_v39, %v2548_v63  ;;  %v2769_v63 = vrot.slane %v4891_v57, %v3798_v48 }
 0x29c   : > { %v1248_v31 = vpop.xlane.xlu1 %1247  ;;  %v3045_v56 = vsel %vm3034_vm1, %v2553_v21, %v3044_v34  ;;  %v2469_v47 = vsel %vm1834_vm13, %v2468_v33, %v2464_v40  ;;  %v2923_v40 = vsel %vm1806_vm9, %v2922_v11, %v4880_v26 }
 0x29d   : > { %v1197_v51 = vpop.xlane.xlu0 %1196  ;;  %v2705_v37 = vrot.slane %v1248_v31, %v3836_v23 }
 0x29e   : > { %v2621_v49 = vrot.slane %v1197_v51, %v3814_v2 }
 0x29f   : > { %v2706_v32 = vsel %vm1834_vm13, %v2705_v37, %v2701_v22 }
 0x2a0   : > { %v1341_v4 = vpop.xlane.xlu1 %1340  ;;  %v2622_v19 = vsel %vm1827_vm12, %v2621_v49, %v2617_v8 }
 0x2a1   : > { %v4908_v58 = vpop.xlane.xlu0 %1289  ;;  %v2858_v27 = vrot.slane %v1341_v4, %v3814_v2 }
 0x2a3   : > { %v2859_v13 = vsel %vm1827_vm12, %v2858_v27, %v2854_v28 }
 0x2a4   : > { %v4910_v42 = vpop.xlane.xlu1 %1433 }
 0x2a5   : > { %v4912_v36 = vpop.xlane.xlu0 %1382  ;;  %v3011_v53 = vrot.slane %v4910_v42, %v3821_v7 }
 0x2a6   : > { %v2927_v33 = vrot.slane %v4912_v36, %v3798_v48 }
 0x2a8   : > { %v1200_v35 = vpop.xlane.xlu1 %1199  ;;  %v2928_v26 = vsel %vm1813_vm10, %v2927_v33, %v2923_v40 }
 0x2a9   : > { %v1107_v18 = vpop.xlane.xlu0 %1106  ;;  %v2626_v16 = vrot.slane %v1200_v35, %v3836_v23  ;;  %v2770_v35 = vsel %vm1813_vm10, %v2769_v63, %v4874_v59 }
 0x2aa   : > { %v2473_v1 = vrot.slane %v1107_v18, %v3830_v20 }
 0x2ab   : > { %v2627_v41 = vsel %vm1834_vm13, %v2626_v16, %v2622_v19 }
 0x2ac   : > { %v2474_v46 = vsel %vm1841_vm14, %v2473_v1, %v2469_v47  ;;  %v1293_v60 = vpop.xlane.xlu1 %1292  ;;  %v3002_v47 = vsel %vm1806_vm9, %v3001_v10, %v4859_v6 }
 0x2ad   : > { %v3035_v0 = vsel %vm3034_vm1, %v2474_v46, %v3033_v55  ;;  %v1251_v24 = vpop.xlane.xlu0 %1250  ;;  %v2779_v4 = vrot.slane %v1293_v60, %v3814_v2  ;;  %v3007_v42 = vsel %vm1813_vm10, %v3006_v30, %v3002_v47 }
 0x2ae   : > { %v2710_v50 = vrot.slane %v1251_v24, %v3830_v20 }
 0x2b0   : > { %v2711_v62 = vsel %vm1841_vm14, %v2710_v50, %v2706_v32  ;;  %v1386_v3 = vpop.xlane.xlu1 %1385 }
 0x2b1   : > { %v1344_v9 = vpop.xlane.xlu0 %1343  ;;  %v3046_v29 = vsel %vm3036_vm2, %v2711_v62, %v3045_v56  ;;  %v2774_v56 = vrot.slane %v4908_v58, %v3821_v7  ;;  %v2932_v18 = vrot.slane %v1386_v3, %v3821_v7 }
 0x2b2   : > { %v2863_v43 = vrot.slane %v1344_v9, %v3836_v23 }
 0x2b3   : > { %v2775_v45 = vsel %vm1820_vm11, %v2774_v56, %v2770_v35  ;;  %v2933_v46 = vsel %vm1820_vm11, %v2932_v18, %v2928_v26 }
 0x2b4   : > { %v1203_v34 = vpop.xlane.xlu1 %1202  ;;  %v2864_v39 = vsel %vm1834_vm13, %v2863_v43, %v2859_v13  ;;  %v2780_v1 = vsel %vm1827_vm12, %v2779_v4, %v2775_v45 }
 0x2b5   : > { %v2631_v17 = vrot.slane %v1203_v34, %v3830_v20  ;;  %v1437_v15 = vpop.xlane.xlu0 %1436 }
 0x2b6   : > { %v3016_v59 = vrot.slane %v1437_v15, %v3814_v2 }
 0x2b7   : > { %v2632_v25 = vsel %vm1841_vm14, %v2631_v17, %v2627_v41 }
 0x2b8   : > { %v1347_v54 = vpop.xlane.xlu1 %1346  ;;  %v3037_v38 = vsel %vm3036_vm2, %v2632_v25, %v3035_v0  ;;  %v3012_v0 = vsel %vm1820_vm11, %v3011_v53, %v3007_v42 }
 0x2b9   : > { %v2868_v55 = vrot.slane %v1347_v54, %v3830_v20  ;;  %v1296_v5 = vpop.xlane.xlu0 %1295 }
 0x2ba   : > { %v2784_v57 = vrot.slane %v1296_v5, %v3836_v23 }
 0x2bb   : > { %v2869_v52 = vsel %vm1841_vm14, %v2868_v55, %v2864_v39 }
 0x2bc   : > { %v1440_v21 = vpop.xlane.xlu1 %1439  ;;  %v3047_v31 = vsel %vm3038_vm3, %v2869_v52, %v3046_v29  ;;  %v2785_v37 = vsel %vm1834_vm13, %v2784_v57, %v2780_v1 }
 0x2bd   : > { %v1389_v51 = vpop.xlane.xlu0 %1388  ;;  %v3021_v7 = vrot.slane %v1440_v21, %v3836_v23 }
 0x2be   : > { %v2937_v44 = vrot.slane %v1389_v51, %v3814_v2 }
 0x2c0   : > { %v1392_v58 = vpop.xlane.xlu1 %1391  ;;  %v2938_v6 = vsel %vm1827_vm12, %v2937_v44, %v2933_v46 }
 0x2c1   : > { %v1299_v36 = vpop.xlane.xlu0 %1298  ;;  %v2942_v48 = vrot.slane %v1392_v58, %v3836_v23  ;;  %v3017_v23 = vsel %vm1827_vm12, %v3016_v59, %v3012_v0 }
 0x2c2   : > { %v2789_v14 = vrot.slane %v1299_v36, %v3830_v20  ;;  %v3022_v62 = vsel %vm1834_vm13, %v3021_v7, %v3017_v23 }
 0x2c3   : > { %v2943_v32 = vsel %vm1834_vm13, %v2942_v48, %v2938_v6 }
 0x2c4   : > { %v2790_v60 = vsel %vm1841_vm14, %v2789_v14, %v2785_v37  ;;  %v1395_v2 = vpop.xlane.xlu1 %1394 }
 0x2c5   : > { %v2947_v24 = vrot.slane %v1395_v2, %v3830_v20  ;;  %v1443_v22 = vpop.xlane.xlu0 %1442  ;;  %v3039_v50 = vsel %vm3038_vm3, %v2790_v60, %v3037_v38 }
 0x2c6   : > { %v3026_v61 = vrot.slane %v1443_v22, %v3830_v20 }
 0x2c7   : > { %v2948_v3 = vsel %vm1841_vm14, %v2947_v24, %v2943_v32 }
 0x2c8   : > { %v3027_v49 = vsel %vm1841_vm14, %v3026_v61, %v3022_v62  ;;  %v3041_v9 = vsel %vm3040_vm4, %v2948_v3, %v3039_v50 }
 0x2c9   : > { %v3048_v29 = vsel %vm3040_vm4, %v3027_v49, %v3047_v31 }
 0x2ca   : > { %3115 = vmatprep.mubr.f32.mxu0 %v3048_v29 }
 0x2cb   : > { %3116 = vmatmul.mubr.f32.vlgmr.msra.gmra.mrb[0].mxu0 %v3041_v9 }
 0x39e   : > { %v3255_v16 = vpop.f32.mrb[0].mxu0 }
 0x39f   : > { %v3256_v8 = vpop.f32.mrb[1].mxu0 }
 0x3a0   : > { %v3257_v20 = vadd.f32 %v3256_v8, %v3255_v16 }
 0x3a2   : > { %3122 = vst.msk [vmem:[%s162_s24] sm:$0xff] %vm3121_vm5, %v3257_v20 }
 0x3a3   : > { %3381 = shalt.err (!%p3378_p2)
}
 0x3a4   : > { %s3382_s27 = scalar_lea.hbm %s4998_s5, 128  ;;  %s3386_s8 = scalar_lea.hbm %s5044_s2, 256 }
 0x3a5   : > { %p3383_p4 = scmp.ne.s32.totalorder %s4998_s5, %s3382_s27  ;;  %p3387_p9 = scmp.lt.u32.totalorder %s4998_s5, %s5044_s2 }
 0x3a6   : > { %p3388_p1 = scmp.lt.u32.totalorder %s3386_s8, %s3382_s27  ;;  %p3390_p6 = scmp.lt.u32.totalorder %s3382_s27, %s4998_s5 }
 0x3a7   : > { %p3384_p5 = pnand %p3383_p4, %p5051_p11 }
 0x3a8   : > { %p3389_p3 = por %p3388_p1, %p3387_p9 }
 0x3a9   : > { %p3385_p7 = pneg %p3384_p5 }
 0x3aa   : > { %p3391_p12 = por %p3390_p6, %p3389_p3 }
 0x3ac   : > { %p3392_p13 = pnand %p3391_p12, %p3385_p7 }
 0x3ae   : > { %3395 = shalt.err (!%p3392_p13)
}
 0x3af   : > { %3292 = dma.vmem_to_hbm [thread:$0]  (%p5051_p11), %s5000_s25, 128, %s4998_s5, %s3124_s20  }
 0x3b0 PF: > { %s3149_s16 = sand.u32 1, %s3422_s9   ;;  %p5052_p8 = scmp.ne.s32.totalorder %s5049_s22, 0 }
 0x3b1   : > { %p5053_p10 = scmp.ge.s32.totalorder %s3434_s12, 2  ;;  %s3150_s17 = scalar_lea.sflag [#allocation4], %s3149_s16 }
 0x3b3   : > { %p3299_p0 = pnand %p5053_p10, %p5052_p8 }
 0x3b5   : > { %3417 = dma.done.wait (!%p3299_p0), %s3150_s17, 128  }
 0x3b6   : > { %3419 = vsyncadd (!%p3299_p0), %s3150_s17, 4294967168  ;;  %p15_p2 = scmp.ge.s32.totalorder %s3480_s15, 4   ;;  %s5054_s9 = smov %s3426_s10 }
 0x3b7   : > { %s5055_s10 = smov %s3430_s11  ;;  %s5056_s11 = smov %s3492_s18 }
 0x3b8   : > { %s5057_s12 = smov %s3480_s15  ;;  %17 = sbr.rel (!%p15_p2) target bundleno = 5 (0x5), region = 73 }
 0x3bf   :  { %3155 = vsyncpa [#allocation3], 1 }
 0x3c0   :  { %3157 = vsyncpa [#allocation3 + $0x1], 1 }
 0x3c1   :  { %3158 = vsyncpa [#allocation4], 1 }
 0x3c2   :  { %3160 = vsyncpa [#allocation4 + $0x1], 1 }

</bundles_post_ra>
